<compile_context>
chip_gen: v7x
topology: tpu7x:2x2x1
jax: 0.10.0
libtpu: 0.0.40
codegen_flags: <defaults>
</compile_context>

<pallas_src>
import jax
import jax.numpy as jnp
from jax.experimental import pallas as pl
from jax.experimental.pallas import tpu as pltpu


def _round_up(x: int, m: int) -> int:
    return (x + m - 1) // m * m


def _pad2d(a, rows: int, cols: int):
    """Zero-pad a 2-D array up to (rows, cols); no-op if already that shape."""
    r, c = a.shape
    if (r, c) == (rows, cols):
        return a
    return jnp.pad(a, ((0, rows - r), (0, cols - c)))


def _pick_tk(f: int, cap: int = 2048):
    """K tile: multiple of 128, <= cap, dividing Fp exactly.

    Fp == F whenever F is already a multiple of 128 (true for real FPN heads,
    F = 256*7*7 = 12544 -> TK = 1792), so the per-forward x pad is a no-op.
    """
    fp = _round_up(f, 128)
    if fp <= cap:
        return fp, fp
    for mult in range(cap // 128, 0, -1):
        tk = 128 * mult
        if fp % tk == 0:
            return tk, fp
    return 128, fp  # unreachable: 128 always divides fp


def _two_mlp_head_kernel(x_ref, w6_ref, b6_ref, w7_ref, b7_ref, out_ref, acc_ref):
    k = pl.program_id(1)

    # fc6 partial product for this K tile (MXU, f32 accumulate).
    partial = jnp.dot(x_ref[...], w6_ref[...], preferred_element_type=jnp.float32)

    @pl.when(k == 0)
    def _first():
        acc_ref[...] = partial            # direct store: no zero-init round trip

    @pl.when(k > 0)
    def _accumulate():
        acc_ref[...] += partial

    @pl.when(k == pl.num_programs(1) - 1)
    def _finalize():
        # Bias + ReLU once per output tile, in f32.
        h = jnp.maximum(acc_ref[...] + b6_ref[...], 0.0)
        # Cast only at the MXU input (bf16 or f32); f32 accumulate.
        y = jnp.dot(h.astype(w7_ref.dtype), w7_ref[...],
                    preferred_element_type=jnp.float32)
        y = jnp.maximum(y + b7_ref[...], 0.0)
        out_ref[...] = y.astype(out_ref.dtype)


def prepare_two_mlp_head_params(w6, b6, w7, b7, compute_dtype=jnp.bfloat16):
    """One-time parameter prep: transpose, pad to TPU-friendly shapes, cast.

    w6: (R, F) torch nn.Linear layout, b6: (R,), w7: (R, R), b7: (R,).
    compute_dtype is the MXU-input dtype (bf16 by default); accumulation,
    bias and ReLU always stay in f32.
    # TODO(synk): optional fp8 w6 (per-output-channel scale folded into the
    # bias/ReLU epilogue) would halve streamed weight bytes again on v7x.
    """
    r, f = w6.shape
    assert w7.shape == (r, r)
    dt = jnp.dtype(compute_dtype)

    rp = _round_up(r, 128)                          # lane-dense outputs
    tk, fp = _pick_tk(f)                            # TK divides Fp exactly

    w6_t = _pad2d(jnp.asarray(w6).T.astype(dt), fp, rp)        # (Fp, Rp)
    w7_t = _pad2d(jnp.asarray(w7).T.astype(dt), rp, rp)        # (Rp, Rp)
    b6_p = _pad2d(jnp.asarray(b6, dtype=jnp.float32).reshape(1, r), 1, rp)
    b7_p = _pad2d(jnp.asarray(b7, dtype=jnp.float32).reshape(1, r), 1, rp)

    return {"w6_t": w6_t, "b6": b6_p, "w7_t": w7_t, "b7": b7_p,
            "r": r, "f": f, "rp": rp, "fp": fp, "tk": tk}


def _call(x_pad, params, tm, tk, n_p, out_dtype, single_buffer_residents):
    rp, fp = params["rp"], params["fp"]
    dt = params["w6_t"].dtype
    itemsize = jnp.dtype(dt).itemsize
    out_itemsize = jnp.dtype(out_dtype).itemsize
    row_tiles = n_p // tm
    grid = (row_tiles, fp // tk)                    # rows parallel, K arbitrary/last

    resident_kwargs = {}
    if single_buffer_residents:
        # Constant (0,0) index_map -> DMA'd once; no second VMEM buffer needed.
        resident_kwargs["pipeline_mode"] = pl.Buffered(1)
    w7_bufs = 1 if single_buffer_residents else 2

    flops = 2 * n_p * fp * rp + 2 * n_p * rp * rp
    bytes_accessed = (x_pad.size * itemsize
                      + params["w6_t"].size * itemsize * row_tiles  # re-streamed / row tile
                      + params["w7_t"].size * itemsize
                      + (params["b6"].size + params["b7"].size) * 4
                      + n_p * rp * out_itemsize)

    # VMEM footprint: double-buffered x / w6 / out tiles, resident w7 + biases,
    # f32 accumulator.  v5e's default scoped limit is only 16 MiB, so derive the
    # limit from the real footprint (with headroom; stays well under v7x 64 MiB
    # physical at the recommended tiles in bf16).
    vmem_bytes = (2 * tm * tk * itemsize            # x tiles
                  + 2 * tk * rp * itemsize          # w6^T tiles
                  + w7_bufs * rp * rp * itemsize    # w7^T (resident)
                  + 2 * w7_bufs * rp * 4            # biases (f32, tiny)
                  + 2 * tm * rp * out_itemsize      # out tiles
                  + tm * rp * 4)                    # accumulator scratch
    vmem_limit = min(100 * 1024 * 1024,
                     max(32 * 1024 * 1024, int(vmem_bytes * 1.25)))

    return pl.pallas_call(
        _two_mlp_head_kernel,
        out_shape=jax.ShapeDtypeStruct((n_p, rp), out_dtype),
        grid=grid,
        in_specs=[
            pl.BlockSpec((tm, tk), lambda i, k: (i, k)),                    # x: K tiles
            pl.BlockSpec((tk, rp), lambda i, k: (k, 0)),                    # w6^T: K tiles
            pl.BlockSpec((1, rp), lambda i, k: (0, 0), **resident_kwargs),  # b6: resident
            pl.BlockSpec((rp, rp), lambda i, k: (0, 0), **resident_kwargs), # w7^T: resident
            pl.BlockSpec((1, rp), lambda i, k: (0, 0), **resident_kwargs),  # b7: resident
        ],
        out_specs=pl.BlockSpec((tm, rp), lambda i, k: (i, 0)),
        scratch_shapes=[pltpu.VMEM((tm, rp), jnp.float32)],  # fc6 accumulator
        compiler_params=pltpu.CompilerParams(
            dimension_semantics=("parallel", "arbitrary"),
            vmem_limit_bytes=vmem_limit),
        cost_estimate=pl.CostEstimate(flops=flops, transcendentals=0,
                                      bytes_accessed=bytes_accessed),
    )(x_pad, params["w6_t"], params["b6"], params["w7_t"], params["b7"])


def two_mlp_head(x_nchw, params):
    """x_nchw: (N, C, H, W). Returns (N, R) = relu(fc7(relu(fc6(flatten(x)))))."""
    n = x_nchw.shape[0]
    x2d = x_nchw.reshape(n, -1)                     # flatten(start_dim=1)
    f, fp, tk, r = params["f"], params["fp"], params["tk"], params["r"]
    assert x2d.shape[1] == f

    dt = params["w6_t"].dtype
    out_dtype = x2d.dtype

    # Row tile: as large as VMEM comfortably allows (cuts w6^T re-streaming and
    # grid-step overhead, fills the 256-row MXU), but keep >= 2 row tiles when
    # the batch allows so the "parallel" axis spans both v7x TensorCores.
    tm = min(512, _round_up(n, 8))
    n_p = _round_up(n, tm)
    if n_p // tm == 1 and n_p >= 16:
        tm = _round_up(max(8, n_p // 2), 8)
        n_p = _round_up(n, tm)

    x_pad = _pad2d(x2d.astype(dt), n_p, fp)         # no-op when F%128==0, N%tm==0

    try:
        out = _call(x_pad, params, tm, tk, n_p, out_dtype,
                    single_buffer_residents=True)
    except Exception:
        # Fallback for jax versions where pl.Buffered(1) is not accepted on a
        # top-level pallas_call BlockSpec; identical kernel, default buffering.
        out = _call(x_pad, params, tm, tk, n_p, out_dtype,
                    single_buffer_residents=False)
    return out[:n, :r]


def _reference(x_nchw, w6, b6, w7, b7):
    x = x_nchw.reshape(x_nchw.shape[0], -1)
    x = jnp.maximum(x @ w6.T + b6, 0.0)
    x = jnp.maximum(x @ w7.T + b7, 0.0)
    return x


if __name__ == "__main__":
    # Small shapes: batch=2, channels=4, spatial=16x16 -> in_channels = 1024
    N, C, H, W = 2, 4, 16, 16
    F_IN = C * H * W
    REPR = 32

    key = jax.random.PRNGKey(0)
    kx, k6w, k6b, k7w, k7b = jax.random.split(key, 5)

    x = jax.random.normal(kx, (N, C, H, W), dtype=jnp.float32)
    # nn.Linear layouts: weight (out, in), bias (out,)
    w6 = jax.random.normal(k6w, (REPR, F_IN), dtype=jnp.float32) * 0.02
    b6 = jax.random.normal(k6b, (REPR,), dtype=jnp.float32) * 0.01
    w7 = jax.random.normal(k7w, (REPR, REPR), dtype=jnp.float32) * 0.02
    b7 = jax.random.normal(k7b, (REPR,), dtype=jnp.float32) * 0.01

    ref = _reference(x, w6, b6, w7, b7)

    # f32 MXU-input path: tight correctness check.
    params_f32 = prepare_two_mlp_head_params(w6, b6, w7, b7,
                                             compute_dtype=jnp.float32)
    out_f32 = jax.block_until_ready(two_mlp_head(x, params_f32))
    assert out_f32.shape == (N, REPR)
    assert jnp.allclose(out_f32, ref, atol=2e-3, rtol=2e-3)

    # bf16 MXU-input path (default; f32 accumulate): looser tolerance.
    params_bf16 = prepare_two_mlp_head_params(w6, b6, w7, b7)
    out_bf16 = jax.block_until_ready(two_mlp_head(x, params_bf16))
    assert out_bf16.shape == (N, REPR)
    assert jnp.allclose(out_bf16, ref, atol=5e-2, rtol=5e-2)

    print("KERNEL_OK")
</pallas_src>

<mosaic_0001>
module attributes {stable_mosaic.version = 11 : i64} {
  func.func @_two_mlp_head_kernel(%arg0: i32, %arg1: i32, %arg2: memref<8x1024xf32, #tpu.memory_space<vmem>>, %arg3: memref<1024x128xf32, #tpu.memory_space<vmem>>, %arg4: memref<1x128xf32, #tpu.memory_space<vmem>>, %arg5: memref<128x128xf32, #tpu.memory_space<vmem>>, %arg6: memref<1x128xf32, #tpu.memory_space<vmem>>, %arg7: memref<8x128xf32, #tpu.memory_space<vmem>>, %arg8: memref<8x128xf32, #tpu.memory_space<vmem>>) attributes {dimension_semantics = [#tpu.dimension_semantics<parallel>, #tpu.dimension_semantics<arbitrary>], iteration_bounds = array<i64: 1, 1>, scalar_prefetch = 0 : i64, scratch_operands = 1 : i64, tpu.core_type = #tpu.core_type<tc>, window_params = [{transform_indices = @transform_0, window_bounds = array<i64: 8, 1024>}, {transform_indices = @transform_1, window_bounds = array<i64: 1024, 128>}, {pipeline_mode = #tpu.pipeline_mode<synchronous>, transform_indices = @transform_2, window_bounds = array<i64: 1, 128>}, {pipeline_mode = #tpu.pipeline_mode<synchronous>, transform_indices = @transform_3, window_bounds = array<i64: 128, 128>}, {pipeline_mode = #tpu.pipeline_mode<synchronous>, transform_indices = @transform_4, window_bounds = array<i64: 1, 128>}, {transform_indices = @transform_5, window_bounds = array<i64: 8, 128>}]} {
    %c0 = arith.constant 0 : index
    %c0_0 = arith.constant 0 : index
    %0 = vector.load %arg2[%c0, %c0_0] : memref<8x1024xf32, #tpu.memory_space<vmem>>, vector<8x1024xf32>
    %c0_1 = arith.constant 0 : index
    %c0_2 = arith.constant 0 : index
    %1 = vector.load %arg3[%c0_1, %c0_2] : memref<1024x128xf32, #tpu.memory_space<vmem>>, vector<1024x128xf32>
    %cst = arith.constant dense<0.000000e+00> : vector<8x128xf32>
    %2 = tpu.matmul %0, %1, %cst {dimension_numbers = #tpu.dot_dimension_numbers<[1], [0], [0], [1], [0, 0, 1, 1], [], []>} : vector<8x1024xf32>, vector<1024x128xf32>, vector<8x128xf32> -> vector<8x128xf32>
    %c0_i32 = arith.constant 0 : i32
    %3 = arith.cmpi eq, %arg1, %c0_i32 : i32
    %4 = arith.extui %3 : i1 to i32
    %c0_i32_3 = arith.constant 0 : i32
    %5 = arith.cmpi ne, %4, %c0_i32_3 : i32
    scf.if %5 {
      %c0_8 = arith.constant 0 : index
      %c0_9 = arith.constant 0 : index
      %12 = vector.load %arg8[%c0_8, %c0_9] : memref<8x128xf32, #tpu.memory_space<vmem>>, vector<8x128xf32>
      tpu.vector_store %arg8[%c0_8, %c0_9], %2 {strides = array<i32>} : memref<8x128xf32, #tpu.memory_space<vmem>>, vector<8x128xf32>,
    } else {
    }
    %c0_i32_4 = arith.constant 0 : i32
    %6 = arith.cmpi sgt, %arg1, %c0_i32_4 : i32
    %7 = arith.extui %6 : i1 to i32
    %c0_i32_5 = arith.constant 0 : i32
    %8 = arith.cmpi ne, %7, %c0_i32_5 : i32
    scf.if %8 {
      %c0_8 = arith.constant 0 : index
      %c0_9 = arith.constant 0 : index
      %12 = vector.load %arg8[%c0_8, %c0_9] : memref<8x128xf32, #tpu.memory_space<vmem>>, vector<8x128xf32>
      %13 = arith.addf %12, %2 : vector<8x128xf32>
      %c0_10 = arith.constant 0 : index
      %c0_11 = arith.constant 0 : index
      %14 = vector.load %arg8[%c0_10, %c0_11] : memref<8x128xf32, #tpu.memory_space<vmem>>, vector<8x128xf32>
      tpu.vector_store %arg8[%c0_10, %c0_11], %13 {strides = array<i32>} : memref<8x128xf32, #tpu.memory_space<vmem>>, vector<8x128xf32>,
    } else {
    }
    %c0_i32_6 = arith.constant 0 : i32
    %9 = arith.cmpi eq, %arg1, %c0_i32_6 : i32
    %10 = arith.extui %9 : i1 to i32
    %c0_i32_7 = arith.constant 0 : i32
    %11 = arith.cmpi ne, %10, %c0_i32_7 : i32
    scf.if %11 {
      %c0_8 = arith.constant 0 : index
      %c0_9 = arith.constant 0 : index
      %12 = vector.load %arg8[%c0_8, %c0_9] : memref<8x128xf32, #tpu.memory_space<vmem>>, vector<8x128xf32>
      %c0_10 = arith.constant 0 : index
      %c0_11 = arith.constant 0 : index
      %13 = vector.load %arg4[%c0_10, %c0_11] : memref<1x128xf32, #tpu.memory_space<vmem>>, vector<1x128xf32>
      %14 = vector.broadcast %13 : vector<1x128xf32> to vector<8x128xf32>
      %15 = arith.addf %12, %14 : vector<8x128xf32>
      %cst_12 = arith.constant 0.000000e+00 : f32
      %16 = vector.broadcast %cst_12 : f32 to vector<8x128xf32>
      %17 = arith.maximumf %15, %16 : vector<8x128xf32>
      %c0_13 = arith.constant 0 : index
      %c0_14 = arith.constant 0 : index
      %18 = vector.load %arg5[%c0_13, %c0_14] : memref<128x128xf32, #tpu.memory_space<vmem>>, vector<128x128xf32>
      %cst_15 = arith.constant dense<0.000000e+00> : vector<8x128xf32>
      %19 = tpu.matmul %17, %18, %cst_15 {dimension_numbers = #tpu.dot_dimension_numbers<[1], [0], [0], [1], [0, 0, 1, 1], [], []>} : vector<8x128xf32>, vector<128x128xf32>, vector<8x128xf32> -> vector<8x128xf32>
      %c0_16 = arith.constant 0 : index
      %c0_17 = arith.constant 0 : index
      %20 = vector.load %arg6[%c0_16, %c0_17] : memref<1x128xf32, #tpu.memory_space<vmem>>, vector<1x128xf32>
      %21 = vector.broadcast %20 : vector<1x128xf32> to vector<8x128xf32>
      %22 = arith.addf %19, %21 : vector<8x128xf32>
      %cst_18 = arith.constant 0.000000e+00 : f32
      %23 = vector.broadcast %cst_18 : f32 to vector<8x128xf32>
      %24 = arith.maximumf %22, %23 : vector<8x128xf32>
      %c0_19 = arith.constant 0 : index
      %c0_20 = arith.constant 0 : index
      %25 = vector.load %arg7[%c0_19, %c0_20] : memref<8x128xf32, #tpu.memory_space<vmem>>, vector<8x128xf32>
      tpu.vector_store %arg7[%c0_19, %c0_20], %24 {strides = array<i32>} : memref<8x128xf32, #tpu.memory_space<vmem>>, vector<8x128xf32>,
    } else {
    }
    return
  }
  func.func @transform_0(%arg0: i32, %arg1: i32) -> (i32, i32) {
    %c0_i32 = arith.constant 0 : i32
    return %arg0, %arg1 : i32, i32
  }
  func.func @transform_1(%arg0: i32, %arg1: i32) -> (i32, i32) {
    %c0_i32 = arith.constant 0 : i32
    %c0_i32_0 = arith.constant 0 : i32
    return %arg1, %c0_i32 : i32, i32
  }
  func.func @transform_2(%arg0: i32, %arg1: i32) -> (i32, i32) {
    %c0_i32 = arith.constant 0 : i32
    %c0_i32_0 = arith.constant 0 : i32
    %c0_i32_1 = arith.constant 0 : i32
    return %c0_i32, %c0_i32_0 : i32, i32
  }
  func.func @transform_3(%arg0: i32, %arg1: i32) -> (i32, i32) {
    %c0_i32 = arith.constant 0 : i32
    %c0_i32_0 = arith.constant 0 : i32
    %c0_i32_1 = arith.constant 0 : i32
    return %c0_i32, %c0_i32_0 : i32, i32
  }
  func.func @transform_4(%arg0: i32, %arg1: i32) -> (i32, i32) {
    %c0_i32 = arith.constant 0 : i32
    %c0_i32_0 = arith.constant 0 : i32
    %c0_i32_1 = arith.constant 0 : i32
    return %c0_i32, %c0_i32_0 : i32, i32
  }
  func.func @transform_5(%arg0: i32, %arg1: i32) -> (i32, i32) {
    %c0_i32 = arith.constant 0 : i32
    %c0_i32_0 = arith.constant 0 : i32
    return %arg0, %c0_i32 : i32, i32
  }
}

module attributes {stable_mosaic.version = 11 : i64} {
  func.func @_two_mlp_head_kernel(%arg0: i32, %arg1: i32, %arg2: memref<8x1024xf32, #tpu.memory_space<vmem>>, %arg3: memref<1024x128xf32, #tpu.memory_space<vmem>>, %arg4: memref<1x128xf32, #tpu.memory_space<vmem>>, %arg5: memref<128x128xf32, #tpu.memory_space<vmem>>, %arg6: memref<1x128xf32, #tpu.memory_space<vmem>>, %arg7: memref<8x128xf32, #tpu.memory_space<vmem>>, %arg8: memref<8x128xf32, #tpu.memory_space<vmem>>) attributes {dimension_semantics = [#tpu.dimension_semantics<parallel>, #tpu.dimension_semantics<arbitrary>], iteration_bounds = array<i64: 1, 1>, scalar_prefetch = 0 : i64, scratch_operands = 1 : i64, tpu.core_type = #tpu.core_type<tc>, window_params = [{transform_indices = @transform_0, window_bounds = array<i64: 8, 1024>}, {transform_indices = @transform_1, window_bounds = array<i64: 1024, 128>}, {pipeline_mode = #tpu.pipeline_mode<synchronous>, transform_indices = @transform_2, window_bounds = array<i64: 1, 128>}, {pipeline_mode = #tpu.pipeline_mode<synchronous>, transform_indices = @transform_3, window_bounds = array<i64: 128, 128>}, {pipeline_mode = #tpu.pipeline_mode<synchronous>, transform_indices = @transform_4, window_bounds = array<i64: 1, 128>}, {transform_indices = @transform_5, window_bounds = array<i64: 8, 128>}]} {
    %c0 = arith.constant 0 : index
    %c0_0 = arith.constant 0 : index
    %0 = vector.load %arg2[%c0, %c0_0] : memref<8x1024xf32, #tpu.memory_space<vmem>>, vector<8x1024xf32>
    %c0_1 = arith.constant 0 : index
    %c0_2 = arith.constant 0 : index
    %1 = vector.load %arg3[%c0_1, %c0_2] : memref<1024x128xf32, #tpu.memory_space<vmem>>, vector<1024x128xf32>
    %cst = arith.constant dense<0.000000e+00> : vector<8x128xf32>
    %2 = tpu.matmul %0, %1, %cst {dimension_numbers = #tpu.dot_dimension_numbers<[1], [0], [0], [1], [0, 0, 1, 1], [], []>} : vector<8x1024xf32>, vector<1024x128xf32>, vector<8x128xf32> -> vector<8x128xf32>
    %c0_i32 = arith.constant 0 : i32
    %3 = arith.cmpi eq, %arg1, %c0_i32 : i32
    %4 = arith.extui %3 : i1 to i32
    %c0_i32_3 = arith.constant 0 : i32
    %5 = arith.cmpi ne, %4, %c0_i32_3 : i32
    scf.if %5 {
      %c0_8 = arith.constant 0 : index
      %c0_9 = arith.constant 0 : index
      %12 = vector.load %arg8[%c0_8, %c0_9] : memref<8x128xf32, #tpu.memory_space<vmem>>, vector<8x128xf32>
      tpu.vector_store %arg8[%c0_8, %c0_9], %2 {strides = array<i32>} : memref<8x128xf32, #tpu.memory_space<vmem>>, vector<8x128xf32>,
    } else {
    }
    %c0_i32_4 = arith.constant 0 : i32
    %6 = arith.cmpi sgt, %arg1, %c0_i32_4 : i32
    %7 = arith.extui %6 : i1 to i32
    %c0_i32_5 = arith.constant 0 : i32
    %8 = arith.cmpi ne, %7, %c0_i32_5 : i32
    scf.if %8 {
      %c0_8 = arith.constant 0 : index
      %c0_9 = arith.constant 0 : index
      %12 = vector.load %arg8[%c0_8, %c0_9] : memref<8x128xf32, #tpu.memory_space<vmem>>, vector<8x128xf32>
      %13 = arith.addf %12, %2 : vector<8x128xf32>
      %c0_10 = arith.constant 0 : index
      %c0_11 = arith.constant 0 : index
      %14 = vector.load %arg8[%c0_10, %c0_11] : memref<8x128xf32, #tpu.memory_space<vmem>>, vector<8x128xf32>
      tpu.vector_store %arg8[%c0_10, %c0_11], %13 {strides = array<i32>} : memref<8x128xf32, #tpu.memory_space<vmem>>, vector<8x128xf32>,
    } else {
    }
    %c0_i32_6 = arith.constant 0 : i32
    %9 = arith.cmpi eq, %arg1, %c0_i32_6 : i32
    %10 = arith.extui %9 : i1 to i32
    %c0_i32_7 = arith.constant 0 : i32
    %11 = arith.cmpi ne, %10, %c0_i32_7 : i32
    scf.if %11 {
      %c0_8 = arith.constant 0 : index
      %c0_9 = arith.constant 0 : index
      %12 = vector.load %arg8[%c0_8, %c0_9] : memref<8x128xf32, #tpu.memory_space<vmem>>, vector<8x128xf32>
      %c0_10 = arith.constant 0 : index
      %c0_11 = arith.constant 0 : index
      %13 = vector.load %arg4[%c0_10, %c0_11] : memref<1x128xf32, #tpu.memory_space<vmem>>, vector<1x128xf32>
      %14 = vector.broadcast %13 : vector<1x128xf32> to vector<8x128xf32>
      %15 = arith.addf %12, %14 : vector<8x128xf32>
      %cst_12 = arith.constant 0.000000e+00 : f32
      %16 = vector.broadcast %cst_12 : f32 to vector<8x128xf32>
      %17 = arith.maximumf %15, %16 : vector<8x128xf32>
      %c0_13 = arith.constant 0 : index
      %c0_14 = arith.constant 0 : index
      %18 = vector.load %arg5[%c0_13, %c0_14] : memref<128x128xf32, #tpu.memory_space<vmem>>, vector<128x128xf32>
      %cst_15 = arith.constant dense<0.000000e+00> : vector<8x128xf32>
      %19 = tpu.matmul %17, %18, %cst_15 {dimension_numbers = #tpu.dot_dimension_numbers<[1], [0], [0], [1], [0, 0, 1, 1], [], []>} : vector<8x128xf32>, vector<128x128xf32>, vector<8x128xf32> -> vector<8x128xf32>
      %c0_16 = arith.constant 0 : index
      %c0_17 = arith.constant 0 : index
      %20 = vector.load %arg6[%c0_16, %c0_17] : memref<1x128xf32, #tpu.memory_space<vmem>>, vector<1x128xf32>
      %21 = vector.broadcast %20 : vector<1x128xf32> to vector<8x128xf32>
      %22 = arith.addf %19, %21 : vector<8x128xf32>
      %cst_18 = arith.constant 0.000000e+00 : f32
      %23 = vector.broadcast %cst_18 : f32 to vector<8x128xf32>
      %24 = arith.maximumf %22, %23 : vector<8x128xf32>
      %c0_19 = arith.constant 0 : index
      %c0_20 = arith.constant 0 : index
      %25 = vector.load %arg7[%c0_19, %c0_20] : memref<8x128xf32, #tpu.memory_space<vmem>>, vector<8x128xf32>
      tpu.vector_store %arg7[%c0_19, %c0_20], %24 {strides = array<i32>} : memref<8x128xf32, #tpu.memory_space<vmem>>, vector<8x128xf32>,
    } else {
    }
    return
  }
  func.func @transform_0(%arg0: i32, %arg1: i32) -> (i32, i32) {
    %c0_i32 = arith.constant 0 : i32
    return %arg0, %arg1 : i32, i32
  }
  func.func @transform_1(%arg0: i32, %arg1: i32) -> (i32, i32) {
    %c0_i32 = arith.constant 0 : i32
    %c0_i32_0 = arith.constant 0 : i32
    return %arg1, %c0_i32 : i32, i32
  }
  func.func @transform_2(%arg0: i32, %arg1: i32) -> (i32, i32) {
    %c0_i32 = arith.constant 0 : i32
    %c0_i32_0 = arith.constant 0 : i32
    %c0_i32_1 = arith.constant 0 : i32
    return %c0_i32, %c0_i32_0 : i32, i32
  }
  func.func @transform_3(%arg0: i32, %arg1: i32) -> (i32, i32) {
    %c0_i32 = arith.constant 0 : i32
    %c0_i32_0 = arith.constant 0 : i32
    %c0_i32_1 = arith.constant 0 : i32
    return %c0_i32, %c0_i32_0 : i32, i32
  }
  func.func @transform_4(%arg0: i32, %arg1: i32) -> (i32, i32) {
    %c0_i32 = arith.constant 0 : i32
    %c0_i32_0 = arith.constant 0 : i32
    %c0_i32_1 = arith.constant 0 : i32
    return %c0_i32, %c0_i32_0 : i32, i32
  }
  func.func @transform_5(%arg0: i32, %arg1: i32) -> (i32, i32) {
    %c0_i32 = arith.constant 0 : i32
    %c0_i32_0 = arith.constant 0 : i32
    return %arg0, %c0_i32 : i32, i32
  }
}

</mosaic_0001>

<bundles_post_ra>
// kernel: tpu_custom_call.1
= control target key start
LH: loop header
LB: loop body
LE: loop exit
PB: predicated region body
PF: predicated region fallthrough
CT: control target
= control target key end

     0   :  { %10 = vsyncpa [#allocation4], 0  ;;  %s1160_s0 = inlined_call_operand.hbm [shape: f32[8,1024], index: 0, kind: input, shape index: {}]   ;;  %s1161_s1 = inlined_call_operand.hbm [shape: f32[1024,128], index: 1, kind: input, shape index: {}]   ;;  %s1162_s2 = inlined_call_operand.vmem [shape: f32[1,128], index: 2, kind: input, shape index: {}]   ;;  %s1163_s3 = inlined_call_operand.hbm [shape: f32[128,128], index: 3, kind: input, shape index: {}]   ;;  %s1164_s4 = inlined_call_operand.vmem [shape: f32[1,128], index: 4, kind: input, shape index: {}]   ;;  %s1165_s5 = inlined_call_operand.hbm [shape: f32[8,128], index: 5, kind: output, shape index: {}]  }
   0x1   :  { %11 = vsyncpa [#allocation7], 0 }
   0x2   :  { %12 = vsyncpa [#allocation5], 0  ;;  %s1061_s18 = smov [#allocation6]   ;;  %s967_s22 = scalar_lea.hbm %s1161_s1, 16384 }
   0x3   :  { %s28_s19 = sshll.u32 %s1061_s18, 4  ;;  %p968_p0 = scmp.ne.s32.totalorder %s1161_s1, %s967_s22  ;;  %s29_s19 = int_to_ptr.vmem [resolvable:$true] %s28_s19 }
   0x4   :  { %p971_p1 = scmp.lt.u32.totalorder %s967_s22, %s1161_s1 }
   0x6   :  { %p973_p2 = pnand %p971_p1, %p968_p0 }
   0x8   :  { %976 = shalt.err (!%p973_p2)
}
   0x9   :  { %s977_s27 = scalar_lea.vmem %s29_s19, 16384  ;;  %p982_p4 = scmp.lt.s32.totalorder %s29_s19, %s29_s19 }
   0xa   :  { %p978_p3 = scmp.ne.s32.totalorder %s29_s19, %s977_s27  ;;  %p983_p5 = scmp.lt.s32.totalorder %s977_s27, %s977_s27 }
   0xc   :  { %p984_p6 = por %p983_p5, %p982_p4 }
   0xe   :  { %p985_p7 = pnand %p984_p6, %p978_p3 }
  0x10   :  { %988 = shalt.err (!%p985_p7)
}
  0x11   :  { %s1062_s28 = smov 128   ;;  %s1063_s29 = smov 8  }
  0x12   :  { %34 = dma.hbm_to_vmem [thread:$0]  %s1161_s1, 16384, %s29_s19, [#allocation7], %s1062_s28, %s1062_s28, %s1063_s29  }
  0x13   :  { %s1064_s7 = smov [#allocation3]   ;;  %s1065_s9 = smov [#allocation8]  }
  0x14   :  { %s19_s8 = sshll.u32 %s1064_s7, 4  ;;  %s42_s10 = sshll.u32 %s1065_s9, 4  ;;  %s20_s8 = int_to_ptr.vmem [resolvable:$true] %s19_s8  ;;  %s43_s10 = int_to_ptr.vmem [resolvable:$true] %s42_s10 }
  0x15   :  { %s989_s13 = scalar_lea.hbm %s1160_s0, 1024 }
  0x16   :  { %p990_p8 = scmp.ne.s32.totalorder %s1160_s0, %s989_s13  ;;  %p993_p9 = scmp.lt.u32.totalorder %s989_s13, %s1160_s0 }
  0x18   :  { %p995_p10 = pnand %p993_p9, %p990_p8 }
  0x1a   :  { %998 = shalt.err (!%p995_p10)
}
  0x1b   :  { %s999_s1 = scalar_lea.vmem %s20_s8, 1024  ;;  %p1004_p12 = scmp.lt.s32.totalorder %s20_s8, %s20_s8 }
  0x1c   :  { %p1000_p11 = scmp.ne.s32.totalorder %s20_s8, %s999_s1  ;;  %p1005_p13 = scmp.lt.s32.totalorder %s999_s1, %s999_s1 }
  0x1e   :  { %p1006_p0 = por %p1005_p13, %p1004_p12 }
  0x20   :  { %p1007_p1 = pnand %p1006_p0, %p1000_p11 }
  0x22   :  { %1010 = shalt.err (!%p1007_p1)
}
  0x23   :  { %22 = dma.hbm_to_vmem [thread:$0]  %s1160_s0, 1024, %s20_s8, [#allocation4]  }
  0x24   :  { %s1011_s22 = scalar_lea.hbm %s1163_s3, 2048 }
  0x25   :  { %p1012_p2 = scmp.ne.s32.totalorder %s1163_s3, %s1011_s22  ;;  %p1015_p3 = scmp.lt.u32.totalorder %s1011_s22, %s1163_s3 }
  0x27   :  { %p1017_p4 = pnand %p1015_p3, %p1012_p2 }
  0x29   :  { %1020 = shalt.err (!%p1017_p4)
}
  0x2a   :  { %s1021_s27 = scalar_lea.vmem %s43_s10, 2048  ;;  %p1026_p6 = scmp.lt.s32.totalorder %s43_s10, %s43_s10 }
  0x2b   :  { %p1022_p5 = scmp.ne.s32.totalorder %s43_s10, %s1021_s27  ;;  %p1027_p7 = scmp.lt.s32.totalorder %s1021_s27, %s1021_s27 }
  0x2d   :  { %p1028_p8 = por %p1027_p7, %p1026_p6 }
  0x2f   :  { %p1029_p9 = pnand %p1028_p8, %p1022_p5 }
  0x31   :  { %1032 = shalt.err (!%p1029_p9)
}
  0x32   :  { %48 = dma.hbm_to_vmem [thread:$0]  %s1163_s3, 2048, %s43_s10, [#allocation7], %s1062_s28, %s1062_s28, %s1063_s29  }
  0x33   :  { %1055 = dma.done.wait [#allocation4], 1024  }
  0x34   :  { %1056 = vsyncadd [#allocation4], 4294966272 }
  0x35   :  { %1057 = dma.done.wait [#allocation7], 18432  }
  0x36   :  { %1058 = vsyncadd [#allocation7], 4294948864  ;;  %v84_v0 = vld [vmem:[#allocation6 + $0x80] sm:$0xff]  ;;  %v85_v1 = vld [vmem:[#allocation6 + $0x88] sm:$0xff]  ;;  %vm1067_vm0 = vmmov 0   ;;  %s1069_s7 = smov [#allocation9]  }
  0x37   :  { %v116_v2 = vld [vmem:[#allocation6 + $0x180] sm:$0xff]  ;;  %v806_v3 = vpack.c.bf16 %v85_v1, %v84_v0  ;;  %v117_v4 = vld [vmem:[#allocation6 + $0x188] sm:$0xff]  ;;  %v86_v11 = vld [vmem:[#allocation6 + $0x90] sm:$0xff]  ;;  %s602_s8 = sshll.u32 %s1069_s7, 4  ;;  %s603_s8 = int_to_ptr.vmem [resolvable:$true] %s602_s8 }
  0x38   :  { %v68_v5 = vld [vmem:[#allocation6] sm:$0xff]  ;;  %v69_v6 = vld [vmem:[#allocation6 + $0x8] sm:$0xff]  ;;  %v838_v7 = vpack.c.bf16 %v117_v4, %v116_v2  ;;  %v87_v13 = vld [vmem:[#allocation6 + $0x98] sm:$0xff]  ;;  %s1033_s9 = scalar_lea.vmem %s603_s8, 128  ;;  %p1038_p11 = scmp.lt.s32.totalorder %s603_s8, %s603_s8 }
  0x39   :  { %v808_v8 = vpack.c.bf16 %v69_v6, %v68_v5  ;;  %v100_v9 = vld [vmem:[#allocation6 + $0x100] sm:$0xff]  ;;  %v101_v10 = vld [vmem:[#allocation6 + $0x108] sm:$0xff]  ;;  %807 = vmatprep.subr.bf16.mxu0 %v806_v3  ;;  %v118_v14 = vld [vmem:[#allocation6 + $0x190] sm:$0xff]  ;;  %v810_v16 = vpack.c.bf16 %v87_v13, %v86_v11  ;;  %p1034_p10 = scmp.ne.s32.totalorder %s603_s8, %s1033_s9  ;;  %p1039_p12 = scmp.lt.s32.totalorder %s1033_s9, %s1033_s9 }
  0x3a   :  { %v840_v12 = vpack.c.bf16 %v101_v10, %v100_v9  ;;  %v119_v15 = vld [vmem:[#allocation6 + $0x198] sm:$0xff]  ;;  %839 = vmatprep.subr.bf16.mxu1 %v838_v7  ;;  %v70_v18 = vld [vmem:[#allocation6 + $0x10] sm:$0xff]  ;;  %v88_v23 = vld [vmem:[#allocation6 + $0xa0] sm:$0xff] }
  0x3b   :  { %809 = vmatpush3.bf16.msra.mxu0 %v808_v8  ;;  %v842_v17 = vpack.c.bf16 %v119_v15, %v118_v14  ;;  %v71_v19 = vld [vmem:[#allocation6 + $0x18] sm:$0xff]  ;;  %v102_v20 = vld [vmem:[#allocation6 + $0x110] sm:$0xff]  ;;  %v89_v24 = vld [vmem:[#allocation6 + $0xa8] sm:$0xff]  ;;  %p1040_p13 = por %p1039_p12, %p1038_p11 }
  0x3c   :  { %841 = vmatpush3.bf16.msra.mxu1 %v840_v12  ;;  %v812_v21 = vpack.c.bf16 %v71_v19, %v70_v18  ;;  %v103_v22 = vld [vmem:[#allocation6 + $0x118] sm:$0xff]  ;;  %811 = vmatprep.subr.bf16.mxu0 %v810_v16  ;;  %v814_v26 = vpack.c.bf16 %v89_v24, %v88_v23  ;;  %v120_v27 = vld [vmem:[#allocation6 + $0x1a0] sm:$0xff]  ;;  %v121_v28 = vld [vmem:[#allocation6 + $0x1a8] sm:$0xff] }
  0x3d   :  { %843 = vmatprep.subr.bf16.mxu1 %v842_v17  ;;  %v844_v25 = vpack.c.bf16 %v103_v22, %v102_v20  ;;  %v72_v29 = vld [vmem:[#allocation6 + $0x20] sm:$0xff]  ;;  %v846_v30 = vpack.c.bf16 %v121_v28, %v120_v27  ;;  %v73_v31 = vld [vmem:[#allocation6 + $0x28] sm:$0xff]  ;;  %v90_v35 = vld [vmem:[#allocation6 + $0xb0] sm:$0xff]  ;;  %p1041_p0 = pnand %p1040_p13, %p1034_p10 }
  0x3e   :  { %v104_v32 = vld [vmem:[#allocation6 + $0x120] sm:$0xff]  ;;  %v105_v33 = vld [vmem:[#allocation6 + $0x128] sm:$0xff]  ;;  %v816_v34 = vpack.c.bf16 %v73_v31, %v72_v29  ;;  %v91_v36 = vld [vmem:[#allocation6 + $0xb8] sm:$0xff] }
  0x3f   :  { %813 = vmatpush3.bf16.msra.mxu0 %v812_v21  ;;  %v122_v37 = vld [vmem:[#allocation6 + $0x1b0] sm:$0xff]  ;;  %v848_v38 = vpack.c.bf16 %v105_v33, %v104_v32  ;;  %v818_v39 = vpack.c.bf16 %v91_v36, %v90_v35  ;;  %v123_v40 = vld [vmem:[#allocation6 + $0x1b8] sm:$0xff]  ;;  %v92_v46 = vld [vmem:[#allocation6 + $0xc0] sm:$0xff] }
  0x40   :  { %845 = vmatpush3.bf16.msra.mxu1 %v844_v25  ;;  %815 = vmatprep.subr.bf16.mxu0 %v814_v26  ;;  %v74_v41 = vld [vmem:[#allocation6 + $0x30] sm:$0xff]  ;;  %v75_v42 = vld [vmem:[#allocation6 + $0x38] sm:$0xff]  ;;  %v850_v43 = vpack.c.bf16 %v123_v40, %v122_v37  ;;  %v93_v47 = vld [vmem:[#allocation6 + $0xc8] sm:$0xff] }
  0x41   :  { %847 = vmatprep.subr.bf16.mxu1 %v846_v30  ;;  %v106_v44 = vld [vmem:[#allocation6 + $0x130] sm:$0xff]  ;;  %v107_v45 = vld [vmem:[#allocation6 + $0x138] sm:$0xff]  ;;  %v124_v48 = vld [vmem:[#allocation6 + $0x1c0] sm:$0xff]  ;;  %v820_v50 = vpack.c.bf16 %v75_v42, %v74_v41  ;;  %v822_v52 = vpack.c.bf16 %v93_v47, %v92_v46 }
  0x42   :  { %v125_v49 = vld [vmem:[#allocation6 + $0x1c8] sm:$0xff]  ;;  %v852_v51 = vpack.c.bf16 %v107_v45, %v106_v44  ;;  %v76_v53 = vld [vmem:[#allocation6 + $0x40] sm:$0xff]  ;;  %v94_v58 = vld [vmem:[#allocation6 + $0xd0] sm:$0xff] }
  0x43   :  { %817 = vmatpush3.bf16.msra.mxu0 %v816_v34  ;;  %v77_v54 = vld [vmem:[#allocation6 + $0x48] sm:$0xff]  ;;  %v108_v55 = vld [vmem:[#allocation6 + $0x140] sm:$0xff]  ;;  %v854_v56 = vpack.c.bf16 %v125_v49, %v124_v48  ;;  %v95_v59 = vld [vmem:[#allocation6 + $0xd8] sm:$0xff] }
  0x44   :  { %849 = vmatpush3.bf16.msra.mxu1 %v848_v38  ;;  %819 = vmatprep.subr.bf16.mxu0 %v818_v39  ;;  %v109_v57 = vld [vmem:[#allocation6 + $0x148] sm:$0xff]  ;;  %v126_v60 = vld [vmem:[#allocation6 + $0x1d0] sm:$0xff]  ;;  %v127_v61 = vld [vmem:[#allocation6 + $0x1d8] sm:$0xff]  ;;  %v824_v62 = vpack.c.bf16 %v77_v54, %v76_v53  ;;  %v826_v0 = vpack.c.bf16 %v95_v59, %v94_v58 }
  0x45   :  { %851 = vmatprep.subr.bf16.mxu1 %v850_v43  ;;  %v856_v63 = vpack.c.bf16 %v109_v57, %v108_v55  ;;  %v78_v1 = vld [vmem:[#allocation6 + $0x50] sm:$0xff]  ;;  %v79_v2 = vld [vmem:[#allocation6 + $0x58] sm:$0xff]  ;;  %v858_v4 = vpack.c.bf16 %v127_v61, %v126_v60  ;;  %v96_v6 = vld [vmem:[#allocation6 + $0xe0] sm:$0xff] }
  0x46   :  { %v110_v3 = vld [vmem:[#allocation6 + $0x150] sm:$0xff]  ;;  %v111_v5 = vld [vmem:[#allocation6 + $0x158] sm:$0xff]  ;;  %v97_v7 = vld [vmem:[#allocation6 + $0xe8] sm:$0xff]  ;;  %v828_v10 = vpack.c.bf16 %v79_v2, %v78_v1 }
  0x47   :  { %821 = vmatpush3.bf16.msra.mxu0 %v820_v50  ;;  %v128_v8 = vld [vmem:[#allocation6 + $0x1e0] sm:$0xff]  ;;  %v129_v9 = vld [vmem:[#allocation6 + $0x1e8] sm:$0xff]  ;;  %v860_v13 = vpack.c.bf16 %v111_v5, %v110_v3  ;;  %v830_v14 = vpack.c.bf16 %v97_v7, %v96_v6  ;;  %v63_v17 = vld [vmem:[#allocation3 + $0x18] sm:$0xff] }
  0x48   :  { %853 = vmatpush3.bf16.msra.mxu1 %v852_v51  ;;  %823 = vmatprep.subr.bf16.mxu0 %v822_v52  ;;  %v80_v11 = vld [vmem:[#allocation6 + $0x60] sm:$0xff]  ;;  %v81_v12 = vld [vmem:[#allocation6 + $0x68] sm:$0xff]  ;;  %v862_v18 = vpack.c.bf16 %v129_v9, %v128_v8  ;;  %v98_v20 = vld [vmem:[#allocation6 + $0xf0] sm:$0xff] }
  0x49   :  { %855 = vmatprep.subr.bf16.mxu1 %v854_v56  ;;  %v112_v15 = vld [vmem:[#allocation6 + $0x160] sm:$0xff]  ;;  %v61_v16 = vld [vmem:[#allocation3 + $0x8] sm:$0xff]  ;;  %v99_v21 = vld [vmem:[#allocation6 + $0xf8] sm:$0xff]  ;;  %330 = vmatprep.mubr.f32.mxu1 %v63_v17  ;;  %v832_v24 = vpack.c.bf16 %v81_v12, %v80_v11 }
  0x4a   :  { %v113_v19 = vld [vmem:[#allocation6 + $0x168] sm:$0xff]  ;;  %260 = vmatprep.mubr.f32.mxu0 %v61_v16  ;;  %v130_v22 = vld [vmem:[#allocation6 + $0x1f0] sm:$0xff]  ;;  %v131_v23 = vld [vmem:[#allocation6 + $0x1f8] sm:$0xff]  ;;  %v834_v26 = vpack.c.bf16 %v99_v21, %v98_v20 }
  0x4b   :  { %825 = vmatpush3.bf16.msra.mxu0 %v824_v62  ;;  %v864_v25 = vpack.c.bf16 %v113_v19, %v112_v15  ;;  %v82_v27 = vld [vmem:[#allocation6 + $0x70] sm:$0xff]  ;;  %v83_v28 = vld [vmem:[#allocation6 + $0x78] sm:$0xff]  ;;  %v866_v30 = vpack.c.bf16 %v131_v23, %v130_v22  ;;  %v148_v32 = vld [vmem:[#allocation6 + $0x280] sm:$0xff] }
  0x4c   :  { %857 = vmatpush3.bf16.msra.mxu1 %v856_v63  ;;  %827 = vmatprep.subr.bf16.mxu0 %v826_v0  ;;  %v114_v29 = vld [vmem:[#allocation6 + $0x170] sm:$0xff]  ;;  %v115_v31 = vld [vmem:[#allocation6 + $0x178] sm:$0xff]  ;;  %v149_v33 = vld [vmem:[#allocation6 + $0x288] sm:$0xff]  ;;  %v836_v36 = vpack.c.bf16 %v83_v28, %v82_v27 }
  0x4d   :  { %859 = vmatprep.subr.bf16.mxu1 %v858_v4  ;;  %v180_v34 = vld [vmem:[#allocation6 + $0x380] sm:$0xff]  ;;  %v181_v35 = vld [vmem:[#allocation6 + $0x388] sm:$0xff]  ;;  %v868_v37 = vpack.c.bf16 %v115_v31, %v114_v29  ;;  %v870_v38 = vpack.c.bf16 %v149_v33, %v148_v32  ;;  %v150_v44 = vld [vmem:[#allocation6 + $0x290] sm:$0xff] }
  0x4e   :  { %v132_v39 = vld [vmem:[#allocation6 + $0x200] sm:$0xff]  ;;  %v133_v40 = vld [vmem:[#allocation6 + $0x208] sm:$0xff]  ;;  %v902_v42 = vpack.c.bf16 %v181_v35, %v180_v34  ;;  %v151_v45 = vld [vmem:[#allocation6 + $0x298] sm:$0xff] }
  0x4f   :  { %829 = vmatpush3.bf16.msra.mxu0 %v828_v10  ;;  %v164_v41 = vld [vmem:[#allocation6 + $0x300] sm:$0xff]  ;;  %v165_v43 = vld [vmem:[#allocation6 + $0x308] sm:$0xff]  ;;  %v182_v46 = vld [vmem:[#allocation6 + $0x390] sm:$0xff]  ;;  %v872_v50 = vpack.c.bf16 %v133_v40, %v132_v39  ;;  %v874_v52 = vpack.c.bf16 %v151_v45, %v150_v44 }
  0x50   :  { %861 = vmatpush3.bf16.msra.mxu1 %v860_v13  ;;  %831 = vmatprep.subr.bf16.mxu0 %v830_v14  ;;  %v183_v47 = vld [vmem:[#allocation6 + $0x398] sm:$0xff]  ;;  %v60_v48 = vld [vmem:[#allocation3] sm:$0xff]  ;;  %v62_v49 = vld [vmem:[#allocation3 + $0x10] sm:$0xff]  ;;  %v904_v51 = vpack.c.bf16 %v165_v43, %v164_v41 }
  0x51   :  { %863 = vmatprep.subr.bf16.mxu1 %v862_v18  ;;  %v134_v53 = vld [vmem:[#allocation6 + $0x210] sm:$0xff]  ;;  %v135_v54 = vld [vmem:[#allocation6 + $0x218] sm:$0xff]  ;;  %v906_v56 = vpack.c.bf16 %v183_v47, %v182_v46  ;;  %v152_v58 = vld [vmem:[#allocation6 + $0x2a0] sm:$0xff] }
  0x52   :  { %v166_v55 = vld [vmem:[#allocation6 + $0x310] sm:$0xff]  ;;  %v167_v57 = vld [vmem:[#allocation6 + $0x318] sm:$0xff]  ;;  %v153_v59 = vld [vmem:[#allocation6 + $0x2a8] sm:$0xff]  ;;  %v876_v62 = vpack.c.bf16 %v135_v54, %v134_v53 }
  0x53   :  { %833 = vmatpush3.bf16.msra.mxu0 %v832_v24  ;;  %v184_v60 = vld [vmem:[#allocation6 + $0x3a0] sm:$0xff]  ;;  %v185_v61 = vld [vmem:[#allocation6 + $0x3a8] sm:$0xff]  ;;  %v908_v63 = vpack.c.bf16 %v167_v57, %v166_v55  ;;  %v878_v0 = vpack.c.bf16 %v153_v59, %v152_v58  ;;  %v154_v6 = vld [vmem:[#allocation6 + $0x2b0] sm:$0xff] }
  0x54   :  { %865 = vmatpush3.bf16.msra.mxu1 %v864_v25  ;;  %835 = vmatprep.subr.bf16.mxu0 %v834_v26  ;;  %v136_v1 = vld [vmem:[#allocation6 + $0x220] sm:$0xff]  ;;  %v137_v2 = vld [vmem:[#allocation6 + $0x228] sm:$0xff]  ;;  %v910_v4 = vpack.c.bf16 %v185_v61, %v184_v60  ;;  %v155_v7 = vld [vmem:[#allocation6 + $0x2b8] sm:$0xff] }
  0x55   :  { %867 = vmatprep.subr.bf16.mxu1 %v866_v30  ;;  %v168_v3 = vld [vmem:[#allocation6 + $0x320] sm:$0xff]  ;;  %v169_v5 = vld [vmem:[#allocation6 + $0x328] sm:$0xff]  ;;  %v186_v8 = vld [vmem:[#allocation6 + $0x3b0] sm:$0xff]  ;;  %v880_v10 = vpack.c.bf16 %v137_v2, %v136_v1  ;;  %v882_v12 = vpack.c.bf16 %v155_v7, %v154_v6 }
  0x56   :  { %v187_v9 = vld [vmem:[#allocation6 + $0x3b8] sm:$0xff]  ;;  %v912_v11 = vpack.c.bf16 %v169_v5, %v168_v3  ;;  %v138_v13 = vld [vmem:[#allocation6 + $0x230] sm:$0xff]  ;;  %v156_v18 = vld [vmem:[#allocation6 + $0x2c0] sm:$0xff] }
  0x57   :  { %837 = vmatpush3.bf16.msra.mxu0 %v836_v36  ;;  %v139_v14 = vld [vmem:[#allocation6 + $0x238] sm:$0xff]  ;;  %v170_v15 = vld [vmem:[#allocation6 + $0x330] sm:$0xff]  ;;  %v914_v16 = vpack.c.bf16 %v187_v9, %v186_v8  ;;  %v157_v19 = vld [vmem:[#allocation6 + $0x2c8] sm:$0xff] }
  0x58   :  { %869 = vmatpush3.bf16.msra.mxu1 %v868_v37  ;;  %871 = vmatprep.subr.bf16.mxu0 %v870_v38  ;;  %v171_v17 = vld [vmem:[#allocation6 + $0x338] sm:$0xff]  ;;  %v188_v20 = vld [vmem:[#allocation6 + $0x3c0] sm:$0xff]  ;;  %v189_v21 = vld [vmem:[#allocation6 + $0x3c8] sm:$0xff]  ;;  %v884_v22 = vpack.c.bf16 %v139_v14, %v138_v13  ;;  %v886_v26 = vpack.c.bf16 %v157_v19, %v156_v18 }
  0x59   :  { %903 = vmatprep.subr.bf16.mxu1 %v902_v42  ;;  %v65_v23 = vld [vmem:[#allocation3 + $0x28] sm:$0xff]  ;;  %v67_v24 = vld [vmem:[#allocation3 + $0x38] sm:$0xff]  ;;  %v916_v25 = vpack.c.bf16 %v171_v17, %v170_v15  ;;  %v140_v27 = vld [vmem:[#allocation6 + $0x240] sm:$0xff]  ;;  %v918_v30 = vpack.c.bf16 %v189_v21, %v188_v20 }
  0x5a   :  { %261 = vmatmul.mubr.f32.vlgmr.msra.gmra.mrb[0].mxu0 %v60_v48  ;;  %v141_v28 = vld [vmem:[#allocation6 + $0x248] sm:$0xff]  ;;  %v172_v29 = vld [vmem:[#allocation6 + $0x340] sm:$0xff]  ;;  %v158_v32 = vld [vmem:[#allocation6 + $0x2d0] sm:$0xff] }
  0x5b   :  { %331 = vmatmul.mubr.f32.vlgmr.msra.gmra.mrb[0].mxu1 %v62_v49  ;;  %873 = vmatpush3.bf16.msra.mxu0 %v872_v50  ;;  %v173_v31 = vld [vmem:[#allocation6 + $0x348] sm:$0xff]  ;;  %v159_v33 = vld [vmem:[#allocation6 + $0x2d8] sm:$0xff]  ;;  %v190_v34 = vld [vmem:[#allocation6 + $0x3d0] sm:$0xff]  ;;  %v888_v36 = vpack.c.bf16 %v141_v28, %v140_v27 }
  0x5c   :  { %905 = vmatpush3.bf16.msra.mxu1 %v904_v51  ;;  %875 = vmatprep.subr.bf16.mxu0 %v874_v52  ;;  %v191_v35 = vld [vmem:[#allocation6 + $0x3d8] sm:$0xff]  ;;  %v920_v37 = vpack.c.bf16 %v173_v31, %v172_v29  ;;  %v890_v38 = vpack.c.bf16 %v159_v33, %v158_v32  ;;  %v142_v39 = vld [vmem:[#allocation6 + $0x250] sm:$0xff]  ;;  %v160_v44 = vld [vmem:[#allocation6 + $0x2e0] sm:$0xff]  ;;  %v1068_v33 = vmov 0.0  }
  0x5d   :  { %907 = vmatprep.subr.bf16.mxu1 %v906_v56  ;;  %400 = vmatprep.mubr.f32.mxu0 %v65_v23  ;;  %v143_v40 = vld [vmem:[#allocation6 + $0x258] sm:$0xff]  ;;  %v174_v41 = vld [vmem:[#allocation6 + $0x350] sm:$0xff]  ;;  %v922_v42 = vpack.c.bf16 %v191_v35, %v190_v34  ;;  %v161_v45 = vld [vmem:[#allocation6 + $0x2e8] sm:$0xff] }
  0x5e   :  { %470 = vmatprep.mubr.f32.mxu1 %v67_v24  ;;  %v175_v43 = vld [vmem:[#allocation6 + $0x358] sm:$0xff]  ;;  %v192_v46 = vld [vmem:[#allocation6 + $0x3e0] sm:$0xff]  ;;  %v193_v47 = vld [vmem:[#allocation6 + $0x3e8] sm:$0xff]  ;;  %v892_v48 = vpack.c.bf16 %v143_v40, %v142_v39  ;;  %v894_v50 = vpack.c.bf16 %v161_v45, %v160_v44 }
  0x5f   :  { %877 = vmatpush3.bf16.msra.mxu0 %v876_v62  ;;  %v924_v49 = vpack.c.bf16 %v175_v43, %v174_v41  ;;  %v144_v51 = vld [vmem:[#allocation6 + $0x260] sm:$0xff]  ;;  %v145_v52 = vld [vmem:[#allocation6 + $0x268] sm:$0xff]  ;;  %v926_v54 = vpack.c.bf16 %v193_v47, %v192_v46  ;;  %v162_v56 = vld [vmem:[#allocation6 + $0x2f0] sm:$0xff] }
  0x60   :  { %909 = vmatpush3.bf16.msra.mxu1 %v908_v63  ;;  %879 = vmatprep.subr.bf16.mxu0 %v878_v0  ;;  %v176_v53 = vld [vmem:[#allocation6 + $0x360] sm:$0xff]  ;;  %v177_v55 = vld [vmem:[#allocation6 + $0x368] sm:$0xff]  ;;  %v163_v57 = vld [vmem:[#allocation6 + $0x2f8] sm:$0xff]  ;;  %v896_v60 = vpack.c.bf16 %v145_v52, %v144_v51 }
  0x61   :  { %911 = vmatprep.subr.bf16.mxu1 %v910_v4  ;;  %v194_v58 = vld [vmem:[#allocation6 + $0x3f0] sm:$0xff]  ;;  %v195_v59 = vld [vmem:[#allocation6 + $0x3f8] sm:$0xff]  ;;  %v928_v61 = vpack.c.bf16 %v177_v55, %v176_v53  ;;  %v898_v62 = vpack.c.bf16 %v163_v57, %v162_v56  ;;  %v64_v6 = vld [vmem:[#allocation3 + $0x20] sm:$0xff] }
  0x62   :  { %v146_v63 = vld [vmem:[#allocation6 + $0x270] sm:$0xff]  ;;  %v147_v0 = vld [vmem:[#allocation6 + $0x278] sm:$0xff]  ;;  %v930_v1 = vpack.c.bf16 %v195_v59, %v194_v58  ;;  %v501_v8 = vld [vmem:[#allocation8] sm:$0xff] }
  0x63   :  { %881 = vmatpush3.bf16.msra.mxu0 %v880_v10  ;;  %v178_v2 = vld [vmem:[#allocation6 + $0x370] sm:$0xff]  ;;  %v179_v3 = vld [vmem:[#allocation6 + $0x378] sm:$0xff]  ;;  %v900_v4 = vpack.c.bf16 %v147_v0, %v146_v63  ;;  %v502_v9 = vld [vmem:[#allocation8 + $0x8] sm:$0xff] }
  0x64   :  { %913 = vmatpush3.bf16.msra.mxu1 %v912_v11  ;;  %883 = vmatprep.subr.bf16.mxu0 %v882_v12  ;;  %v932_v5 = vpack.c.bf16 %v179_v3, %v178_v2  ;;  %v66_v7 = vld [vmem:[#allocation3 + $0x30] sm:$0xff]  ;;  %v1066_v11 = vmov 0.0|0.0   ;;  %v935_v12 = vpack.c.bf16 %v502_v9, %v501_v8  ;;  %v504_v13 = vld [vmem:[#allocation8 + $0x18] sm:$0xff]  ;;  %v505_v15 = vld [vmem:[#allocation8 + $0x20] sm:$0xff] }
  0x65   :  { %915 = vmatprep.subr.bf16.mxu1 %v914_v16  ;;  %v503_v10 = vld [vmem:[#allocation8 + $0x10] sm:$0xff]  ;;  %v506_v16 = vld [vmem:[#allocation8 + $0x28] sm:$0xff]  ;;  %v508_v19 = vld [vmem:[#allocation8 + $0x38] sm:$0xff] }
  0x66   :  { %v938_v14 = vpack.c.bf16 %v504_v13, %v503_v10  ;;  %v941_v17 = vpack.c.bf16 %v506_v16, %v505_v15  ;;  %v507_v18 = vld [vmem:[#allocation8 + $0x30] sm:$0xff]  ;;  %v509_v21 = vld [vmem:[#allocation8 + $0x40] sm:$0xff]  ;;  %v514_v28 = vld [vmem:[#allocation8 + $0x68] sm:$0xff] }
  0x67   :  { %885 = vmatpush3.bf16.msra.mxu0 %v884_v22  ;;  %v944_v20 = vpack.c.bf16 %v508_v19, %v507_v18  ;;  %v510_v22 = vld [vmem:[#allocation8 + $0x48] sm:$0xff]  ;;  %v511_v24 = vld [vmem:[#allocation8 + $0x50] sm:$0xff]  ;;  %v513_v27 = vld [vmem:[#allocation8 + $0x60] sm:$0xff] }
  0x68   :  { %917 = vmatpush3.bf16.msra.mxu1 %v916_v25  ;;  %887 = vmatprep.subr.bf16.mxu0 %v886_v26  ;;  %v947_v23 = vpack.c.bf16 %v510_v22, %v509_v21  ;;  %v512_v25 = vld [vmem:[#allocation8 + $0x58] sm:$0xff]  ;;  %v953_v29 = vpack.c.bf16 %v514_v28, %v513_v27  ;;  %v613_v52 = vld [vmem:[%s1164_s4] ss:$0 sm:$0xff] }
  0x69   :  { %919 = vmatprep.subr.bf16.mxu1 %v918_v30  ;;  %v950_v26 = vpack.c.bf16 %v512_v25, %v511_v24  ;;  %v515_v30 = vld [vmem:[#allocation8 + $0x70] sm:$0xff]  ;;  %v516_v31 = vld [vmem:[#allocation8 + $0x78] sm:$0xff] }
  0x6a   :  { %v956_v32 = vpack.c.bf16 %v516_v31, %v515_v30 }
  0x6b   :  { %889 = vmatpush3.bf16.msra.mxu0 %v888_v36 }
  0x6c   :  { %921 = vmatpush3.bf16.msra.mxu1 %v920_v37  ;;  %891 = vmatprep.subr.bf16.mxu0 %v890_v38 }
  0x6d   :  { %923 = vmatprep.subr.bf16.mxu1 %v922_v42 }
  0x6f   :  { %893 = vmatpush3.bf16.msra.mxu0 %v892_v48  ;;  %v612_v48 = vld [vmem:[%s1162_s2] ss:$0 sm:$0xff] }
  0x70   :  { %925 = vmatpush3.bf16.msra.mxu1 %v924_v49  ;;  %895 = vmatprep.subr.bf16.mxu0 %v894_v50 }
  0x71   :  { %927 = vmatprep.subr.bf16.mxu1 %v926_v54 }
  0x73   :  { %897 = vmatpush3.bf16.msra.mxu0 %v896_v60 }
  0x74   :  { %929 = vmatpush3.bf16.msra.mxu1 %v928_v61  ;;  %899 = vmatprep.subr.bf16.mxu0 %v898_v62 }
  0x75   :  { %931 = vmatprep.subr.bf16.mxu1 %v930_v1 }
  0x77   :  { %901 = vmatpush3.bf16.msra.mxu0 %v900_v4 }
  0x78   :  { %933 = vmatpush3.bf16.msra.mxu1 %v932_v5  ;;  %934 = vmatprep.subr.bf16.mxu0 %v1066_v11 }
  0x7a   :  { %401 = vmatmul.mubr.f32.vlgmr.msra.gmra.mrb[2].mxu0 %v64_v6 }
  0x7b   :  { %471 = vmatmul.mubr.f32.vlgmr.msra.gmra.mrb[2].mxu1 %v66_v7  ;;  %936 = vmatpush3.bf16.msra.mxu0 %v935_v12 }
  0x7c   :  { %937 = vmatprep.subr.bf16.mxu0 %v1066_v11  ;;  %803 = vmatprep.mubr.msk.f32.mxu0 %vm1067_vm0, %v1068_v33 }
  0x7f   :  { %939 = vmatpush3.bf16.msra.mxu0 %v938_v14 }
  0x80   :  { %940 = vmatprep.subr.bf16.mxu0 %v1066_v11 }
  0x83   :  { %942 = vmatpush3.bf16.msra.mxu0 %v941_v17 }
  0x84   :  { %943 = vmatprep.subr.bf16.mxu0 %v1066_v11 }
  0x87   :  { %945 = vmatpush3.bf16.msra.mxu0 %v944_v20 }
  0x88   :  { %946 = vmatprep.subr.bf16.mxu0 %v1066_v11 }
  0x8b   :  { %948 = vmatpush3.bf16.msra.mxu0 %v947_v23 }
  0x8c   :  { %949 = vmatprep.subr.bf16.mxu0 %v1066_v11 }
  0x8f   :  { %951 = vmatpush3.bf16.msra.mxu0 %v950_v26 }
  0x90   :  { %952 = vmatprep.subr.bf16.mxu0 %v1066_v11 }
  0x93   :  { %954 = vmatpush3.bf16.msra.mxu0 %v953_v29 }
  0x94   :  { %955 = vmatprep.subr.bf16.mxu0 %v1066_v11 }
  0x97   :  { %957 = vmatpush3.bf16.msra.mxu0 %v956_v32 }
 0x12d   :  { %v646_v34 = vpop.f32.mrb[0].mxu0 }
 0x12e   :  { %v681_v35 = vpop.f32.mrb[0].mxu1  ;;  %v647_v36 = vpop.f32.mrb[1].mxu0 }
 0x12f   :  { %v648_v37 = vadd.f32 %v647_v36, %v646_v34  ;;  %v682_v38 = vpop.f32.mrb[1].mxu1 }
 0x130   :  { %v683_v39 = vadd.f32 %v682_v38, %v681_v35 }
 0x132   :  { %v333_v40 = vadd.f32 %v683_v39, %v648_v37 }
 0x14d   :  { %v716_v41 = vpop.f32.mrb[2].mxu0 }
 0x14e   :  { %v717_v42 = vpop.f32.mrb[3].mxu0  ;;  %v751_v43 = vpop.f32.mrb[2].mxu1 }
 0x14f   :  { %v718_v44 = vadd.f32 %v717_v42, %v716_v41  ;;  %v752_v45 = vpop.f32.mrb[3].mxu1 }
 0x150   :  { %v753_v46 = vadd.f32 %v752_v45, %v751_v43 }
 0x151   :  { %v403_v47 = vadd.f32 %v718_v44, %v333_v40 }
 0x153   :  { %v473_v49 = vadd.f32 %v753_v46, %v403_v47 }
 0x155   :  { %v499_v50 = vadd.f32 %v612_v48, %v473_v49 }
 0x157   :  { %v500_v51 = vmax.f32 %v499_v50, 0.0 }
 0x159   :  { %804 = vmatmul.mubr.f32.vlgmr.msra.gmra.mrb[4].mxu0 %v500_v51 }
 0x22c   :  { %v590_v53 = vpop.f32.mrb[4].mxu0 }
 0x22d   :  { %v591_v54 = vadd.f32 %v613_v52, %v590_v53  ;;  %v805_v55 = vpop.f32.mrb[5].mxu0 }
 0x22f   :  { %v594_v56 = vmax.f32 %v591_v54, 0.0 }
 0x231   :  { %595 = vst [vmem:[#allocation9] sm:$0xff] %v594_v56 }
 0x232   :  { %1044 = shalt.err (!%p1041_p0)
}
 0x233   :  { %s1045_s11 = scalar_lea.hbm %s1165_s5, 128 }
 0x234   :  { %p1046_p1 = scmp.ne.s32.totalorder %s1165_s5, %s1045_s11  ;;  %p1049_p2 = scmp.lt.u32.totalorder %s1045_s11, %s1165_s5 }
 0x236   :  { %p1051_p3 = pnand %p1049_p2, %p1046_p1 }
 0x238   :  { %1054 = shalt.err (!%p1051_p3)
}
 0x239   :  { %605 = dma.vmem_to_hbm [thread:$0]  %s603_s8, 128, %s1165_s5, [#allocation5]  }
 0x23a   :  { %1059 = dma.done.wait [#allocation5], 128  }
 0x23b   :  { %1060 = vsyncadd [#allocation5], 4294967168 }
 0x23c   :  { %609 = vsyncpa [#allocation4], 1 }
 0x23d   :  { %610 = vsyncpa [#allocation7], 1 }
 0x23e   :  { %611 = vsyncpa [#allocation5], 1 }

// kernel: tpu_custom_call.1
= control target key start
LH: loop header
LB: loop body
LE: loop exit
PB: predicated region body
PF: predicated region fallthrough
CT: control target
= control target key end

     0   :  { %10 = vsyncpa [#allocation4], 0  ;;  %s1160_s0 = inlined_call_operand.hbm [shape: f32[8,1024], index: 0, kind: input, shape index: {}]   ;;  %s1161_s1 = inlined_call_operand.hbm [shape: f32[1024,128], index: 1, kind: input, shape index: {}]   ;;  %s1162_s2 = inlined_call_operand.vmem [shape: f32[1,128], index: 2, kind: input, shape index: {}]   ;;  %s1163_s3 = inlined_call_operand.hbm [shape: f32[128,128], index: 3, kind: input, shape index: {}]   ;;  %s1164_s4 = inlined_call_operand.vmem [shape: f32[1,128], index: 4, kind: input, shape index: {}]   ;;  %s1165_s5 = inlined_call_operand.hbm [shape: f32[8,128], index: 5, kind: output, shape index: {}]  }
   0x1   :  { %11 = vsyncpa [#allocation7], 0 }
   0x2   :  { %12 = vsyncpa [#allocation5], 0  ;;  %s1061_s18 = smov [#allocation6]   ;;  %s967_s22 = scalar_lea.hbm %s1161_s1, 16384 }
   0x3   :  { %s28_s19 = sshll.u32 %s1061_s18, 4  ;;  %p968_p0 = scmp.ne.s32.totalorder %s1161_s1, %s967_s22  ;;  %s29_s19 = int_to_ptr.vmem [resolvable:$true] %s28_s19 }
   0x4   :  { %p971_p1 = scmp.lt.u32.totalorder %s967_s22, %s1161_s1 }
   0x6   :  { %p973_p2 = pnand %p971_p1, %p968_p0 }
   0x8   :  { %976 = shalt.err (!%p973_p2)
}
   0x9   :  { %s977_s27 = scalar_lea.vmem %s29_s19, 16384  ;;  %p982_p4 = scmp.lt.s32.totalorder %s29_s19, %s29_s19 }
   0xa   :  { %p978_p3 = scmp.ne.s32.totalorder %s29_s19, %s977_s27  ;;  %p983_p5 = scmp.lt.s32.totalorder %s977_s27, %s977_s27 }
   0xc   :  { %p984_p6 = por %p983_p5, %p982_p4 }
   0xe   :  { %p985_p7 = pnand %p984_p6, %p978_p3 }
  0x10   :  { %988 = shalt.err (!%p985_p7)
}
  0x11   :  { %s1062_s28 = smov 128   ;;  %s1063_s29 = smov 8  }
  0x12   :  { %34 = dma.hbm_to_vmem [thread:$0]  %s1161_s1, 16384, %s29_s19, [#allocation7], %s1062_s28, %s1062_s28, %s1063_s29  }
  0x13   :  { %s1064_s7 = smov [#allocation3]   ;;  %s1065_s9 = smov [#allocation8]  }
  0x14   :  { %s19_s8 = sshll.u32 %s1064_s7, 4  ;;  %s42_s10 = sshll.u32 %s1065_s9, 4  ;;  %s20_s8 = int_to_ptr.vmem [resolvable:$true] %s19_s8  ;;  %s43_s10 = int_to_ptr.vmem [resolvable:$true] %s42_s10 }
  0x15   :  { %s989_s13 = scalar_lea.hbm %s1160_s0, 1024 }
  0x16   :  { %p990_p8 = scmp.ne.s32.totalorder %s1160_s0, %s989_s13  ;;  %p993_p9 = scmp.lt.u32.totalorder %s989_s13, %s1160_s0 }
  0x18   :  { %p995_p10 = pnand %p993_p9, %p990_p8 }
  0x1a   :  { %998 = shalt.err (!%p995_p10)
}
  0x1b   :  { %s999_s1 = scalar_lea.vmem %s20_s8, 1024  ;;  %p1004_p12 = scmp.lt.s32.totalorder %s20_s8, %s20_s8 }
  0x1c   :  { %p1000_p11 = scmp.ne.s32.totalorder %s20_s8, %s999_s1  ;;  %p1005_p13 = scmp.lt.s32.totalorder %s999_s1, %s999_s1 }
  0x1e   :  { %p1006_p0 = por %p1005_p13, %p1004_p12 }
  0x20   :  { %p1007_p1 = pnand %p1006_p0, %p1000_p11 }
  0x22   :  { %1010 = shalt.err (!%p1007_p1)
}
  0x23   :  { %22 = dma.hbm_to_vmem [thread:$0]  %s1160_s0, 1024, %s20_s8, [#allocation4]  }
  0x24   :  { %s1011_s22 = scalar_lea.hbm %s1163_s3, 2048 }
  0x25   :  { %p1012_p2 = scmp.ne.s32.totalorder %s1163_s3, %s1011_s22  ;;  %p1015_p3 = scmp.lt.u32.totalorder %s1011_s22, %s1163_s3 }
  0x27   :  { %p1017_p4 = pnand %p1015_p3, %p1012_p2 }
  0x29   :  { %1020 = shalt.err (!%p1017_p4)
}
  0x2a   :  { %s1021_s27 = scalar_lea.vmem %s43_s10, 2048  ;;  %p1026_p6 = scmp.lt.s32.totalorder %s43_s10, %s43_s10 }
  0x2b   :  { %p1022_p5 = scmp.ne.s32.totalorder %s43_s10, %s1021_s27  ;;  %p1027_p7 = scmp.lt.s32.totalorder %s1021_s27, %s1021_s27 }
  0x2d   :  { %p1028_p8 = por %p1027_p7, %p1026_p6 }
  0x2f   :  { %p1029_p9 = pnand %p1028_p8, %p1022_p5 }
  0x31   :  { %1032 = shalt.err (!%p1029_p9)
}
  0x32   :  { %48 = dma.hbm_to_vmem [thread:$0]  %s1163_s3, 2048, %s43_s10, [#allocation7], %s1062_s28, %s1062_s28, %s1063_s29  }
  0x33   :  { %1055 = dma.done.wait [#allocation4], 1024  }
  0x34   :  { %1056 = vsyncadd [#allocation4], 4294966272 }
  0x35   :  { %1057 = dma.done.wait [#allocation7], 18432  }
  0x36   :  { %1058 = vsyncadd [#allocation7], 4294948864  ;;  %v84_v0 = vld [vmem:[#allocation6 + $0x80] sm:$0xff]  ;;  %v85_v1 = vld [vmem:[#allocation6 + $0x88] sm:$0xff]  ;;  %vm1067_vm0 = vmmov 0   ;;  %s1069_s7 = smov [#allocation9]  }
  0x37   :  { %v116_v2 = vld [vmem:[#allocation6 + $0x180] sm:$0xff]  ;;  %v806_v3 = vpack.c.bf16 %v85_v1, %v84_v0  ;;  %v117_v4 = vld [vmem:[#allocation6 + $0x188] sm:$0xff]  ;;  %v86_v11 = vld [vmem:[#allocation6 + $0x90] sm:$0xff]  ;;  %s602_s8 = sshll.u32 %s1069_s7, 4  ;;  %s603_s8 = int_to_ptr.vmem [resolvable:$true] %s602_s8 }
  0x38   :  { %v68_v5 = vld [vmem:[#allocation6] sm:$0xff]  ;;  %v69_v6 = vld [vmem:[#allocation6 + $0x8] sm:$0xff]  ;;  %v838_v7 = vpack.c.bf16 %v117_v4, %v116_v2  ;;  %v87_v13 = vld [vmem:[#allocation6 + $0x98] sm:$0xff]  ;;  %s1033_s9 = scalar_lea.vmem %s603_s8, 128  ;;  %p1038_p11 = scmp.lt.s32.totalorder %s603_s8, %s603_s8 }
  0x39   :  { %v808_v8 = vpack.c.bf16 %v69_v6, %v68_v5  ;;  %v100_v9 = vld [vmem:[#allocation6 + $0x100] sm:$0xff]  ;;  %v101_v10 = vld [vmem:[#allocation6 + $0x108] sm:$0xff]  ;;  %807 = vmatprep.subr.bf16.mxu0 %v806_v3  ;;  %v118_v14 = vld [vmem:[#allocation6 + $0x190] sm:$0xff]  ;;  %v810_v16 = vpack.c.bf16 %v87_v13, %v86_v11  ;;  %p1034_p10 = scmp.ne.s32.totalorder %s603_s8, %s1033_s9  ;;  %p1039_p12 = scmp.lt.s32.totalorder %s1033_s9, %s1033_s9 }
  0x3a   :  { %v840_v12 = vpack.c.bf16 %v101_v10, %v100_v9  ;;  %v119_v15 = vld [vmem:[#allocation6 + $0x198] sm:$0xff]  ;;  %839 = vmatprep.subr.bf16.mxu1 %v838_v7  ;;  %v70_v18 = vld [vmem:[#allocation6 + $0x10] sm:$0xff]  ;;  %v88_v23 = vld [vmem:[#allocation6 + $0xa0] sm:$0xff] }
  0x3b   :  { %809 = vmatpush3.bf16.msra.mxu0 %v808_v8  ;;  %v842_v17 = vpack.c.bf16 %v119_v15, %v118_v14  ;;  %v71_v19 = vld [vmem:[#allocation6 + $0x18] sm:$0xff]  ;;  %v102_v20 = vld [vmem:[#allocation6 + $0x110] sm:$0xff]  ;;  %v89_v24 = vld [vmem:[#allocation6 + $0xa8] sm:$0xff]  ;;  %p1040_p13 = por %p1039_p12, %p1038_p11 }
  0x3c   :  { %841 = vmatpush3.bf16.msra.mxu1 %v840_v12  ;;  %v812_v21 = vpack.c.bf16 %v71_v19, %v70_v18  ;;  %v103_v22 = vld [vmem:[#allocation6 + $0x118] sm:$0xff]  ;;  %811 = vmatprep.subr.bf16.mxu0 %v810_v16  ;;  %v814_v26 = vpack.c.bf16 %v89_v24, %v88_v23  ;;  %v120_v27 = vld [vmem:[#allocation6 + $0x1a0] sm:$0xff]  ;;  %v121_v28 = vld [vmem:[#allocation6 + $0x1a8] sm:$0xff] }
  0x3d   :  { %843 = vmatprep.subr.bf16.mxu1 %v842_v17  ;;  %v844_v25 = vpack.c.bf16 %v103_v22, %v102_v20  ;;  %v72_v29 = vld [vmem:[#allocation6 + $0x20] sm:$0xff]  ;;  %v846_v30 = vpack.c.bf16 %v121_v28, %v120_v27  ;;  %v73_v31 = vld [vmem:[#allocation6 + $0x28] sm:$0xff]  ;;  %v90_v35 = vld [vmem:[#allocation6 + $0xb0] sm:$0xff]  ;;  %p1041_p0 = pnand %p1040_p13, %p1034_p10 }
  0x3e   :  { %v104_v32 = vld [vmem:[#allocation6 + $0x120] sm:$0xff]  ;;  %v105_v33 = vld [vmem:[#allocation6 + $0x128] sm:$0xff]  ;;  %v816_v34 = vpack.c.bf16 %v73_v31, %v72_v29  ;;  %v91_v36 = vld [vmem:[#allocation6 + $0xb8] sm:$0xff] }
  0x3f   :  { %813 = vmatpush3.bf16.msra.mxu0 %v812_v21  ;;  %v122_v37 = vld [vmem:[#allocation6 + $0x1b0] sm:$0xff]  ;;  %v848_v38 = vpack.c.bf16 %v105_v33, %v104_v32  ;;  %v818_v39 = vpack.c.bf16 %v91_v36, %v90_v35  ;;  %v123_v40 = vld [vmem:[#allocation6 + $0x1b8] sm:$0xff]  ;;  %v92_v46 = vld [vmem:[#allocation6 + $0xc0] sm:$0xff] }
  0x40   :  { %845 = vmatpush3.bf16.msra.mxu1 %v844_v25  ;;  %815 = vmatprep.subr.bf16.mxu0 %v814_v26  ;;  %v74_v41 = vld [vmem:[#allocation6 + $0x30] sm:$0xff]  ;;  %v75_v42 = vld [vmem:[#allocation6 + $0x38] sm:$0xff]  ;;  %v850_v43 = vpack.c.bf16 %v123_v40, %v122_v37  ;;  %v93_v47 = vld [vmem:[#allocation6 + $0xc8] sm:$0xff] }
  0x41   :  { %847 = vmatprep.subr.bf16.mxu1 %v846_v30  ;;  %v106_v44 = vld [vmem:[#allocation6 + $0x130] sm:$0xff]  ;;  %v107_v45 = vld [vmem:[#allocation6 + $0x138] sm:$0xff]  ;;  %v124_v48 = vld [vmem:[#allocation6 + $0x1c0] sm:$0xff]  ;;  %v820_v50 = vpack.c.bf16 %v75_v42, %v74_v41  ;;  %v822_v52 = vpack.c.bf16 %v93_v47, %v92_v46 }
  0x42   :  { %v125_v49 = vld [vmem:[#allocation6 + $0x1c8] sm:$0xff]  ;;  %v852_v51 = vpack.c.bf16 %v107_v45, %v106_v44  ;;  %v76_v53 = vld [vmem:[#allocation6 + $0x40] sm:$0xff]  ;;  %v94_v58 = vld [vmem:[#allocation6 + $0xd0] sm:$0xff] }
  0x43   :  { %817 = vmatpush3.bf16.msra.mxu0 %v816_v34  ;;  %v77_v54 = vld [vmem:[#allocation6 + $0x48] sm:$0xff]  ;;  %v108_v55 = vld [vmem:[#allocation6 + $0x140] sm:$0xff]  ;;  %v854_v56 = vpack.c.bf16 %v125_v49, %v124_v48  ;;  %v95_v59 = vld [vmem:[#allocation6 + $0xd8] sm:$0xff] }
  0x44   :  { %849 = vmatpush3.bf16.msra.mxu1 %v848_v38  ;;  %819 = vmatprep.subr.bf16.mxu0 %v818_v39  ;;  %v109_v57 = vld [vmem:[#allocation6 + $0x148] sm:$0xff]  ;;  %v126_v60 = vld [vmem:[#allocation6 + $0x1d0] sm:$0xff]  ;;  %v127_v61 = vld [vmem:[#allocation6 + $0x1d8] sm:$0xff]  ;;  %v824_v62 = vpack.c.bf16 %v77_v54, %v76_v53  ;;  %v826_v0 = vpack.c.bf16 %v95_v59, %v94_v58 }
  0x45   :  { %851 = vmatprep.subr.bf16.mxu1 %v850_v43  ;;  %v856_v63 = vpack.c.bf16 %v109_v57, %v108_v55  ;;  %v78_v1 = vld [vmem:[#allocation6 + $0x50] sm:$0xff]  ;;  %v79_v2 = vld [vmem:[#allocation6 + $0x58] sm:$0xff]  ;;  %v858_v4 = vpack.c.bf16 %v127_v61, %v126_v60  ;;  %v96_v6 = vld [vmem:[#allocation6 + $0xe0] sm:$0xff] }
  0x46   :  { %v110_v3 = vld [vmem:[#allocation6 + $0x150] sm:$0xff]  ;;  %v111_v5 = vld [vmem:[#allocation6 + $0x158] sm:$0xff]  ;;  %v97_v7 = vld [vmem:[#allocation6 + $0xe8] sm:$0xff]  ;;  %v828_v10 = vpack.c.bf16 %v79_v2, %v78_v1 }
  0x47   :  { %821 = vmatpush3.bf16.msra.mxu0 %v820_v50  ;;  %v128_v8 = vld [vmem:[#allocation6 + $0x1e0] sm:$0xff]  ;;  %v129_v9 = vld [vmem:[#allocation6 + $0x1e8] sm:$0xff]  ;;  %v860_v13 = vpack.c.bf16 %v111_v5, %v110_v3  ;;  %v830_v14 = vpack.c.bf16 %v97_v7, %v96_v6  ;;  %v63_v17 = vld [vmem:[#allocation3 + $0x18] sm:$0xff] }
  0x48   :  { %853 = vmatpush3.bf16.msra.mxu1 %v852_v51  ;;  %823 = vmatprep.subr.bf16.mxu0 %v822_v52  ;;  %v80_v11 = vld [vmem:[#allocation6 + $0x60] sm:$0xff]  ;;  %v81_v12 = vld [vmem:[#allocation6 + $0x68] sm:$0xff]  ;;  %v862_v18 = vpack.c.bf16 %v129_v9, %v128_v8  ;;  %v98_v20 = vld [vmem:[#allocation6 + $0xf0] sm:$0xff] }
  0x49   :  { %855 = vmatprep.subr.bf16.mxu1 %v854_v56  ;;  %v112_v15 = vld [vmem:[#allocation6 + $0x160] sm:$0xff]  ;;  %v61_v16 = vld [vmem:[#allocation3 + $0x8] sm:$0xff]  ;;  %v99_v21 = vld [vmem:[#allocation6 + $0xf8] sm:$0xff]  ;;  %330 = vmatprep.mubr.f32.mxu1 %v63_v17  ;;  %v832_v24 = vpack.c.bf16 %v81_v12, %v80_v11 }
  0x4a   :  { %v113_v19 = vld [vmem:[#allocation6 + $0x168] sm:$0xff]  ;;  %260 = vmatprep.mubr.f32.mxu0 %v61_v16  ;;  %v130_v22 = vld [vmem:[#allocation6 + $0x1f0] sm:$0xff]  ;;  %v131_v23 = vld [vmem:[#allocation6 + $0x1f8] sm:$0xff]  ;;  %v834_v26 = vpack.c.bf16 %v99_v21, %v98_v20 }
  0x4b   :  { %825 = vmatpush3.bf16.msra.mxu0 %v824_v62  ;;  %v864_v25 = vpack.c.bf16 %v113_v19, %v112_v15  ;;  %v82_v27 = vld [vmem:[#allocation6 + $0x70] sm:$0xff]  ;;  %v83_v28 = vld [vmem:[#allocation6 + $0x78] sm:$0xff]  ;;  %v866_v30 = vpack.c.bf16 %v131_v23, %v130_v22  ;;  %v148_v32 = vld [vmem:[#allocation6 + $0x280] sm:$0xff] }
  0x4c   :  { %857 = vmatpush3.bf16.msra.mxu1 %v856_v63  ;;  %827 = vmatprep.subr.bf16.mxu0 %v826_v0  ;;  %v114_v29 = vld [vmem:[#allocation6 + $0x170] sm:$0xff]  ;;  %v115_v31 = vld [vmem:[#allocation6 + $0x178] sm:$0xff]  ;;  %v149_v33 = vld [vmem:[#allocation6 + $0x288] sm:$0xff]  ;;  %v836_v36 = vpack.c.bf16 %v83_v28, %v82_v27 }
  0x4d   :  { %859 = vmatprep.subr.bf16.mxu1 %v858_v4  ;;  %v180_v34 = vld [vmem:[#allocation6 + $0x380] sm:$0xff]  ;;  %v181_v35 = vld [vmem:[#allocation6 + $0x388] sm:$0xff]  ;;  %v868_v37 = vpack.c.bf16 %v115_v31, %v114_v29  ;;  %v870_v38 = vpack.c.bf16 %v149_v33, %v148_v32  ;;  %v150_v44 = vld [vmem:[#allocation6 + $0x290] sm:$0xff] }
  0x4e   :  { %v132_v39 = vld [vmem:[#allocation6 + $0x200] sm:$0xff]  ;;  %v133_v40 = vld [vmem:[#allocation6 + $0x208] sm:$0xff]  ;;  %v902_v42 = vpack.c.bf16 %v181_v35, %v180_v34  ;;  %v151_v45 = vld [vmem:[#allocation6 + $0x298] sm:$0xff] }
  0x4f   :  { %829 = vmatpush3.bf16.msra.mxu0 %v828_v10  ;;  %v164_v41 = vld [vmem:[#allocation6 + $0x300] sm:$0xff]  ;;  %v165_v43 = vld [vmem:[#allocation6 + $0x308] sm:$0xff]  ;;  %v182_v46 = vld [vmem:[#allocation6 + $0x390] sm:$0xff]  ;;  %v872_v50 = vpack.c.bf16 %v133_v40, %v132_v39  ;;  %v874_v52 = vpack.c.bf16 %v151_v45, %v150_v44 }
  0x50   :  { %861 = vmatpush3.bf16.msra.mxu1 %v860_v13  ;;  %831 = vmatprep.subr.bf16.mxu0 %v830_v14  ;;  %v183_v47 = vld [vmem:[#allocation6 + $0x398] sm:$0xff]  ;;  %v60_v48 = vld [vmem:[#allocation3] sm:$0xff]  ;;  %v62_v49 = vld [vmem:[#allocation3 + $0x10] sm:$0xff]  ;;  %v904_v51 = vpack.c.bf16 %v165_v43, %v164_v41 }
  0x51   :  { %863 = vmatprep.subr.bf16.mxu1 %v862_v18  ;;  %v134_v53 = vld [vmem:[#allocation6 + $0x210] sm:$0xff]  ;;  %v135_v54 = vld [vmem:[#allocation6 + $0x218] sm:$0xff]  ;;  %v906_v56 = vpack.c.bf16 %v183_v47, %v182_v46  ;;  %v152_v58 = vld [vmem:[#allocation6 + $0x2a0] sm:$0xff] }
  0x52   :  { %v166_v55 = vld [vmem:[#allocation6 + $0x310] sm:$0xff]  ;;  %v167_v57 = vld [vmem:[#allocation6 + $0x318] sm:$0xff]  ;;  %v153_v59 = vld [vmem:[#allocation6 + $0x2a8] sm:$0xff]  ;;  %v876_v62 = vpack.c.bf16 %v135_v54, %v134_v53 }
  0x53   :  { %833 = vmatpush3.bf16.msra.mxu0 %v832_v24  ;;  %v184_v60 = vld [vmem:[#allocation6 + $0x3a0] sm:$0xff]  ;;  %v185_v61 = vld [vmem:[#allocation6 + $0x3a8] sm:$0xff]  ;;  %v908_v63 = vpack.c.bf16 %v167_v57, %v166_v55  ;;  %v878_v0 = vpack.c.bf16 %v153_v59, %v152_v58  ;;  %v154_v6 = vld [vmem:[#allocation6 + $0x2b0] sm:$0xff] }
  0x54   :  { %865 = vmatpush3.bf16.msra.mxu1 %v864_v25  ;;  %835 = vmatprep.subr.bf16.mxu0 %v834_v26  ;;  %v136_v1 = vld [vmem:[#allocation6 + $0x220] sm:$0xff]  ;;  %v137_v2 = vld [vmem:[#allocation6 + $0x228] sm:$0xff]  ;;  %v910_v4 = vpack.c.bf16 %v185_v61, %v184_v60  ;;  %v155_v7 = vld [vmem:[#allocation6 + $0x2b8] sm:$0xff] }
  0x55   :  { %867 = vmatprep.subr.bf16.mxu1 %v866_v30  ;;  %v168_v3 = vld [vmem:[#allocation6 + $0x320] sm:$0xff]  ;;  %v169_v5 = vld [vmem:[#allocation6 + $0x328] sm:$0xff]  ;;  %v186_v8 = vld [vmem:[#allocation6 + $0x3b0] sm:$0xff]  ;;  %v880_v10 = vpack.c.bf16 %v137_v2, %v136_v1  ;;  %v882_v12 = vpack.c.bf16 %v155_v7, %v154_v6 }
  0x56   :  { %v187_v9 = vld [vmem:[#allocation6 + $0x3b8] sm:$0xff]  ;;  %v912_v11 = vpack.c.bf16 %v169_v5, %v168_v3  ;;  %v138_v13 = vld [vmem:[#allocation6 + $0x230] sm:$0xff]  ;;  %v156_v18 = vld [vmem:[#allocation6 + $0x2c0] sm:$0xff] }
  0x57   :  { %837 = vmatpush3.bf16.msra.mxu0 %v836_v36  ;;  %v139_v14 = vld [vmem:[#allocation6 + $0x238] sm:$0xff]  ;;  %v170_v15 = vld [vmem:[#allocation6 + $0x330] sm:$0xff]  ;;  %v914_v16 = vpack.c.bf16 %v187_v9, %v186_v8  ;;  %v157_v19 = vld [vmem:[#allocation6 + $0x2c8] sm:$0xff] }
  0x58   :  { %869 = vmatpush3.bf16.msra.mxu1 %v868_v37  ;;  %871 = vmatprep.subr.bf16.mxu0 %v870_v38  ;;  %v171_v17 = vld [vmem:[#allocation6 + $0x338] sm:$0xff]  ;;  %v188_v20 = vld [vmem:[#allocation6 + $0x3c0] sm:$0xff]  ;;  %v189_v21 = vld [vmem:[#allocation6 + $0x3c8] sm:$0xff]  ;;  %v884_v22 = vpack.c.bf16 %v139_v14, %v138_v13  ;;  %v886_v26 = vpack.c.bf16 %v157_v19, %v156_v18 }
  0x59   :  { %903 = vmatprep.subr.bf16.mxu1 %v902_v42  ;;  %v65_v23 = vld [vmem:[#allocation3 + $0x28] sm:$0xff]  ;;  %v67_v24 = vld [vmem:[#allocation3 + $0x38] sm:$0xff]  ;;  %v916_v25 = vpack.c.bf16 %v171_v17, %v170_v15  ;;  %v140_v27 = vld [vmem:[#allocation6 + $0x240] sm:$0xff]  ;;  %v918_v30 = vpack.c.bf16 %v189_v21, %v188_v20 }
  0x5a   :  { %261 = vmatmul.mubr.f32.vlgmr.msra.gmra.mrb[0].mxu0 %v60_v48  ;;  %v141_v28 = vld [vmem:[#allocation6 + $0x248] sm:$0xff]  ;;  %v172_v29 = vld [vmem:[#allocation6 + $0x340] sm:$0xff]  ;;  %v158_v32 = vld [vmem:[#allocation6 + $0x2d0] sm:$0xff] }
  0x5b   :  { %331 = vmatmul.mubr.f32.vlgmr.msra.gmra.mrb[0].mxu1 %v62_v49  ;;  %873 = vmatpush3.bf16.msra.mxu0 %v872_v50  ;;  %v173_v31 = vld [vmem:[#allocation6 + $0x348] sm:$0xff]  ;;  %v159_v33 = vld [vmem:[#allocation6 + $0x2d8] sm:$0xff]  ;;  %v190_v34 = vld [vmem:[#allocation6 + $0x3d0] sm:$0xff]  ;;  %v888_v36 = vpack.c.bf16 %v141_v28, %v140_v27 }
  0x5c   :  { %905 = vmatpush3.bf16.msra.mxu1 %v904_v51  ;;  %875 = vmatprep.subr.bf16.mxu0 %v874_v52  ;;  %v191_v35 = vld [vmem:[#allocation6 + $0x3d8] sm:$0xff]  ;;  %v920_v37 = vpack.c.bf16 %v173_v31, %v172_v29  ;;  %v890_v38 = vpack.c.bf16 %v159_v33, %v158_v32  ;;  %v142_v39 = vld [vmem:[#allocation6 + $0x250] sm:$0xff]  ;;  %v160_v44 = vld [vmem:[#allocation6 + $0x2e0] sm:$0xff]  ;;  %v1068_v33 = vmov 0.0  }
  0x5d   :  { %907 = vmatprep.subr.bf16.mxu1 %v906_v56  ;;  %400 = vmatprep.mubr.f32.mxu0 %v65_v23  ;;  %v143_v40 = vld [vmem:[#allocation6 + $0x258] sm:$0xff]  ;;  %v174_v41 = vld [vmem:[#allocation6 + $0x350] sm:$0xff]  ;;  %v922_v42 = vpack.c.bf16 %v191_v35, %v190_v34  ;;  %v161_v45 = vld [vmem:[#allocation6 + $0x2e8] sm:$0xff] }
  0x5e   :  { %470 = vmatprep.mubr.f32.mxu1 %v67_v24  ;;  %v175_v43 = vld [vmem:[#allocation6 + $0x358] sm:$0xff]  ;;  %v192_v46 = vld [vmem:[#allocation6 + $0x3e0] sm:$0xff]  ;;  %v193_v47 = vld [vmem:[#allocation6 + $0x3e8] sm:$0xff]  ;;  %v892_v48 = vpack.c.bf16 %v143_v40, %v142_v39  ;;  %v894_v50 = vpack.c.bf16 %v161_v45, %v160_v44 }
  0x5f   :  { %877 = vmatpush3.bf16.msra.mxu0 %v876_v62  ;;  %v924_v49 = vpack.c.bf16 %v175_v43, %v174_v41  ;;  %v144_v51 = vld [vmem:[#allocation6 + $0x260] sm:$0xff]  ;;  %v145_v52 = vld [vmem:[#allocation6 + $0x268] sm:$0xff]  ;;  %v926_v54 = vpack.c.bf16 %v193_v47, %v192_v46  ;;  %v162_v56 = vld [vmem:[#allocation6 + $0x2f0] sm:$0xff] }
  0x60   :  { %909 = vmatpush3.bf16.msra.mxu1 %v908_v63  ;;  %879 = vmatprep.subr.bf16.mxu0 %v878_v0  ;;  %v176_v53 = vld [vmem:[#allocation6 + $0x360] sm:$0xff]  ;;  %v177_v55 = vld [vmem:[#allocation6 + $0x368] sm:$0xff]  ;;  %v163_v57 = vld [vmem:[#allocation6 + $0x2f8] sm:$0xff]  ;;  %v896_v60 = vpack.c.bf16 %v145_v52, %v144_v51 }
  0x61   :  { %911 = vmatprep.subr.bf16.mxu1 %v910_v4  ;;  %v194_v58 = vld [vmem:[#allocation6 + $0x3f0] sm:$0xff]  ;;  %v195_v59 = vld [vmem:[#allocation6 + $0x3f8] sm:$0xff]  ;;  %v928_v61 = vpack.c.bf16 %v177_v55, %v176_v53  ;;  %v898_v62 = vpack.c.bf16 %v163_v57, %v162_v56  ;;  %v64_v6 = vld [vmem:[#allocation3 + $0x20] sm:$0xff] }
  0x62   :  { %v146_v63 = vld [vmem:[#allocation6 + $0x270] sm:$0xff]  ;;  %v147_v0 = vld [vmem:[#allocation6 + $0x278] sm:$0xff]  ;;  %v930_v1 = vpack.c.bf16 %v195_v59, %v194_v58  ;;  %v501_v8 = vld [vmem:[#allocation8] sm:$0xff] }
  0x63   :  { %881 = vmatpush3.bf16.msra.mxu0 %v880_v10  ;;  %v178_v2 = vld [vmem:[#allocation6 + $0x370] sm:$0xff]  ;;  %v179_v3 = vld [vmem:[#allocation6 + $0x378] sm:$0xff]  ;;  %v900_v4 = vpack.c.bf16 %v147_v0, %v146_v63  ;;  %v502_v9 = vld [vmem:[#allocation8 + $0x8] sm:$0xff] }
  0x64   :  { %913 = vmatpush3.bf16.msra.mxu1 %v912_v11  ;;  %883 = vmatprep.subr.bf16.mxu0 %v882_v12  ;;  %v932_v5 = vpack.c.bf16 %v179_v3, %v178_v2  ;;  %v66_v7 = vld [vmem:[#allocation3 + $0x30] sm:$0xff]  ;;  %v1066_v11 = vmov 0.0|0.0   ;;  %v935_v12 = vpack.c.bf16 %v502_v9, %v501_v8  ;;  %v504_v13 = vld [vmem:[#allocation8 + $0x18] sm:$0xff]  ;;  %v505_v15 = vld [vmem:[#allocation8 + $0x20] sm:$0xff] }
  0x65   :  { %915 = vmatprep.subr.bf16.mxu1 %v914_v16  ;;  %v503_v10 = vld [vmem:[#allocation8 + $0x10] sm:$0xff]  ;;  %v506_v16 = vld [vmem:[#allocation8 + $0x28] sm:$0xff]  ;;  %v508_v19 = vld [vmem:[#allocation8 + $0x38] sm:$0xff] }
  0x66   :  { %v938_v14 = vpack.c.bf16 %v504_v13, %v503_v10  ;;  %v941_v17 = vpack.c.bf16 %v506_v16, %v505_v15  ;;  %v507_v18 = vld [vmem:[#allocation8 + $0x30] sm:$0xff]  ;;  %v509_v21 = vld [vmem:[#allocation8 + $0x40] sm:$0xff]  ;;  %v514_v28 = vld [vmem:[#allocation8 + $0x68] sm:$0xff] }
  0x67   :  { %885 = vmatpush3.bf16.msra.mxu0 %v884_v22  ;;  %v944_v20 = vpack.c.bf16 %v508_v19, %v507_v18  ;;  %v510_v22 = vld [vmem:[#allocation8 + $0x48] sm:$0xff]  ;;  %v511_v24 = vld [vmem:[#allocation8 + $0x50] sm:$0xff]  ;;  %v513_v27 = vld [vmem:[#allocation8 + $0x60] sm:$0xff] }
  0x68   :  { %917 = vmatpush3.bf16.msra.mxu1 %v916_v25  ;;  %887 = vmatprep.subr.bf16.mxu0 %v886_v26  ;;  %v947_v23 = vpack.c.bf16 %v510_v22, %v509_v21  ;;  %v512_v25 = vld [vmem:[#allocation8 + $0x58] sm:$0xff]  ;;  %v953_v29 = vpack.c.bf16 %v514_v28, %v513_v27  ;;  %v613_v52 = vld [vmem:[%s1164_s4] ss:$0 sm:$0xff] }
  0x69   :  { %919 = vmatprep.subr.bf16.mxu1 %v918_v30  ;;  %v950_v26 = vpack.c.bf16 %v512_v25, %v511_v24  ;;  %v515_v30 = vld [vmem:[#allocation8 + $0x70] sm:$0xff]  ;;  %v516_v31 = vld [vmem:[#allocation8 + $0x78] sm:$0xff] }
  0x6a   :  { %v956_v32 = vpack.c.bf16 %v516_v31, %v515_v30 }
  0x6b   :  { %889 = vmatpush3.bf16.msra.mxu0 %v888_v36 }
  0x6c   :  { %921 = vmatpush3.bf16.msra.mxu1 %v920_v37  ;;  %891 = vmatprep.subr.bf16.mxu0 %v890_v38 }
  0x6d   :  { %923 = vmatprep.subr.bf16.mxu1 %v922_v42 }
  0x6f   :  { %893 = vmatpush3.bf16.msra.mxu0 %v892_v48  ;;  %v612_v48 = vld [vmem:[%s1162_s2] ss:$0 sm:$0xff] }
  0x70   :  { %925 = vmatpush3.bf16.msra.mxu1 %v924_v49  ;;  %895 = vmatprep.subr.bf16.mxu0 %v894_v50 }
  0x71   :  { %927 = vmatprep.subr.bf16.mxu1 %v926_v54 }
  0x73   :  { %897 = vmatpush3.bf16.msra.mxu0 %v896_v60 }
  0x74   :  { %929 = vmatpush3.bf16.msra.mxu1 %v928_v61  ;;  %899 = vmatprep.subr.bf16.mxu0 %v898_v62 }
  0x75   :  { %931 = vmatprep.subr.bf16.mxu1 %v930_v1 }
  0x77   :  { %901 = vmatpush3.bf16.msra.mxu0 %v900_v4 }
  0x78   :  { %933 = vmatpush3.bf16.msra.mxu1 %v932_v5  ;;  %934 = vmatprep.subr.bf16.mxu0 %v1066_v11 }
  0x7a   :  { %401 = vmatmul.mubr.f32.vlgmr.msra.gmra.mrb[2].mxu0 %v64_v6 }
  0x7b   :  { %471 = vmatmul.mubr.f32.vlgmr.msra.gmra.mrb[2].mxu1 %v66_v7  ;;  %936 = vmatpush3.bf16.msra.mxu0 %v935_v12 }
  0x7c   :  { %937 = vmatprep.subr.bf16.mxu0 %v1066_v11  ;;  %803 = vmatprep.mubr.msk.f32.mxu0 %vm1067_vm0, %v1068_v33 }
  0x7f   :  { %939 = vmatpush3.bf16.msra.mxu0 %v938_v14 }
  0x80   :  { %940 = vmatprep.subr.bf16.mxu0 %v1066_v11 }
  0x83   :  { %942 = vmatpush3.bf16.msra.mxu0 %v941_v17 }
  0x84   :  { %943 = vmatprep.subr.bf16.mxu0 %v1066_v11 }
  0x87   :  { %945 = vmatpush3.bf16.msra.mxu0 %v944_v20 }
  0x88   :  { %946 = vmatprep.subr.bf16.mxu0 %v1066_v11 }
  0x8b   :  { %948 = vmatpush3.bf16.msra.mxu0 %v947_v23 }
  0x8c   :  { %949 = vmatprep.subr.bf16.mxu0 %v1066_v11 }
  0x8f   :  { %951 = vmatpush3.bf16.msra.mxu0 %v950_v26 }
  0x90   :  { %952 = vmatprep.subr.bf16.mxu0 %v1066_v11 }
  0x93   :  { %954 = vmatpush3.bf16.msra.mxu0 %v953_v29 }
  0x94   :  { %955 = vmatprep.subr.bf16.mxu0 %v1066_v11 }
  0x97   :  { %957 = vmatpush3.bf16.msra.mxu0 %v956_v32 }
 0x12d   :  { %v646_v34 = vpop.f32.mrb[0].mxu0 }
 0x12e   :  { %v681_v35 = vpop.f32.mrb[0].mxu1  ;;  %v647_v36 = vpop.f32.mrb[1].mxu0 }
 0x12f   :  { %v648_v37 = vadd.f32 %v647_v36, %v646_v34  ;;  %v682_v38 = vpop.f32.mrb[1].mxu1 }
 0x130   :  { %v683_v39 = vadd.f32 %v682_v38, %v681_v35 }
 0x132   :  { %v333_v40 = vadd.f32 %v683_v39, %v648_v37 }
 0x14d   :  { %v716_v41 = vpop.f32.mrb[2].mxu0 }
 0x14e   :  { %v717_v42 = vpop.f32.mrb[3].mxu0  ;;  %v751_v43 = vpop.f32.mrb[2].mxu1 }
 0x14f   :  { %v718_v44 = vadd.f32 %v717_v42, %v716_v41  ;;  %v752_v45 = vpop.f32.mrb[3].mxu1 }
 0x150   :  { %v753_v46 = vadd.f32 %v752_v45, %v751_v43 }
 0x151   :  { %v403_v47 = vadd.f32 %v718_v44, %v333_v40 }
 0x153   :  { %v473_v49 = vadd.f32 %v753_v46, %v403_v47 }
 0x155   :  { %v499_v50 = vadd.f32 %v612_v48, %v473_v49 }
 0x157   :  { %v500_v51 = vmax.f32 %v499_v50, 0.0 }
 0x159   :  { %804 = vmatmul.mubr.f32.vlgmr.msra.gmra.mrb[4].mxu0 %v500_v51 }
 0x22c   :  { %v590_v53 = vpop.f32.mrb[4].mxu0 }
 0x22d   :  { %v591_v54 = vadd.f32 %v613_v52, %v590_v53  ;;  %v805_v55 = vpop.f32.mrb[5].mxu0 }
 0x22f   :  { %v594_v56 = vmax.f32 %v591_v54, 0.0 }
 0x231   :  { %595 = vst [vmem:[#allocation9] sm:$0xff] %v594_v56 }
 0x232   :  { %1044 = shalt.err (!%p1041_p0)
}
 0x233   :  { %s1045_s11 = scalar_lea.hbm %s1165_s5, 128 }
 0x234   :  { %p1046_p1 = scmp.ne.s32.totalorder %s1165_s5, %s1045_s11  ;;  %p1049_p2 = scmp.lt.u32.totalorder %s1045_s11, %s1165_s5 }
 0x236   :  { %p1051_p3 = pnand %p1049_p2, %p1046_p1 }
 0x238   :  { %1054 = shalt.err (!%p1051_p3)
}
 0x239   :  { %605 = dma.vmem_to_hbm [thread:$0]  %s603_s8, 128, %s1165_s5, [#allocation5]  }
 0x23a   :  { %1059 = dma.done.wait [#allocation5], 128  }
 0x23b   :  { %1060 = vsyncadd [#allocation5], 4294967168 }
 0x23c   :  { %609 = vsyncpa [#allocation4], 1 }
 0x23d   :  { %610 = vsyncpa [#allocation7], 1 }
 0x23e   :  { %611 = vsyncpa [#allocation5], 1 }

</bundles_post_ra>
